<compile_context>
chip_gen: v6e
topology: v6e:2x2x1
jax: 0.10.0
libtpu: 0.0.40
codegen_flags: <defaults>
</compile_context>

<pallas_src>
import functools

import jax
import jax.numpy as jnp
from jax import lax
from jax.experimental import pallas as pl
from jax.experimental.pallas import tpu as pltpu

K = 3            # conv kernel size   (fixed by the module)
N_CONV_OUT = 16  # conv out channels  (fixed by the module)
HIDDEN = 128     # fc1 width          (fixed by the module)


# ---------------------------------------------------------------------------
# Fused Pallas kernel: grouped conv-GEMM + relu + fc1 + relu + fc_logits
# ---------------------------------------------------------------------------
def _fused_actor_kernel(pg_ref, wcg_ref, bcg_ref, w1g_ref, b1_ref, w2_ref,
                        b2_ref, o_ref, *, n_groups):
    """One grid step handles `block_b` batch elements; whole network fused.

    pg_ref : (G, block_b, s*Kfeat) bf16  grouped im2col patches (unpadded)
    wcg_ref: (s*Kfeat, s*OC)       bf16  block-diag grouped conv weight
    bcg_ref: (1, s*OC)             f32   conv bias tiled s times
    w1g_ref: (G, s*OC, H1)         bf16  fc1 weight, rows regrouped to match
    b1_ref : (1, H1)               f32
    w2_ref : (H1, Apad)            f32   fc_logits weight, zero-padded lanes
    b2_ref : (1, Apad)             f32
    o_ref  : (block_b, Apad)       f32   lane-dense logits slab
    """
    block_b = o_ref.shape[0]
    h1 = b1_ref.shape[1]
    wcg = wcg_ref[...]
    bcg = bcg_ref[...]

    h = jnp.zeros((block_b, h1), jnp.float32)
    for g in range(n_groups):                      # static unroll (G is small)
        # Conv-as-GEMM for spatial group g: M=block_b, K=s*Kfeat, N=s*OC.
        act = jnp.dot(pg_ref[g], wcg, preferred_element_type=jnp.float32)
        # ReLU here is elementwise-equivalent to PyTorch's post-Flatten ReLU.
        act = jnp.maximum(act + bcg, 0.0).astype(jnp.bfloat16)
        # Partial fc1 contraction for this group (bf16 x bf16, f32 accumulate).
        h = h + jnp.dot(act, w1g_ref[g], preferred_element_type=jnp.float32)
    h = jnp.maximum(h + b1_ref[...], 0.0)
    # fc_logits kept in f32 (tiny); padded columns A..Apad-1 are exact zeros.
    o_ref[...] = jnp.dot(h, w2_ref[...],
                         preferred_element_type=jnp.float32) + b2_ref[...]


# ---------------------------------------------------------------------------
# Small helpers
# ---------------------------------------------------------------------------
def _pick_group_size(p, max_s=8):
    for s in range(min(max_s, p), 0, -1):
        if p % s == 0:
            return s
    return 1


def _pick_block_b(batch, target=256):
    if batch <= target:
        return batch
    for d in range(min(target, batch), 0, -1):
        if batch % d == 0 and d % 8 == 0:
            return d
    return batch


def _const_spec(block_shape, index_map):
    """Grid-invariant operand: request single buffering when supported."""
    try:
        return pl.BlockSpec(block_shape, index_map,
                            pipeline_mode=pl.Buffered(1))
    except TypeError:   # older BlockSpec signature without pipeline_mode
        return pl.BlockSpec(block_shape, index_map)


# ---------------------------------------------------------------------------
# JAX glue: unpadded, grouped im2col in bf16
# ---------------------------------------------------------------------------
def _im2col_grouped(x, group_size):
    """x: (B, C, H, W) f32 -> (G, B, s*Kfeat) bf16.

    Inner index = j*Kfeat + (ci*9 + kh*3 + kw)  with spatial p = g*s + j,
    matching the PyTorch OIHW weight flatten and NCHW feature flatten.
    """
    B, C, H, W = x.shape
    Ho, Wo = H - K + 1, W - K + 1
    P = Ho * Wo
    kfeat = C * K * K
    G = P // group_size
    cols = jnp.stack(
        [x[:, :, i:i + Ho, j:j + Wo] for i in range(K) for j in range(K)],
        axis=2)                                      # (B, C, 9, Ho, Wo)
    cols = cols.reshape(B, kfeat, P)                 # k = ci*9 + kh*3 + kw
    cols = cols.transpose(0, 2, 1)                   # (B, P, Kfeat)
    cols = cols.reshape(B, G, group_size, kfeat)     # p = g*s + j
    cols = cols.transpose(1, 0, 2, 3).reshape(G, B, group_size * kfeat)
    return cols.astype(jnp.bfloat16)


# ---------------------------------------------------------------------------
# Forward wrapper
# ---------------------------------------------------------------------------
def actor_forward(x, params, *, block_b=None):
    """x: (B, C, H, W) float32 -> logits (B, n_actions) float32."""
    wcg, bcg, w1g = params["wcg"], params["bcg"], params["w1g"]
    b1, w2p, b2p = params["b1"], params["w2p"], params["b2p"]
    s = params["group_size"]
    n_actions = params["n_actions"]

    B, C, H, W = x.shape
    Ho, Wo = H - K + 1, W - K + 1
    P = Ho * Wo
    kfeat = C * K * K
    G = P // s
    assert G * s == P, (P, s)
    assert wcg.shape == (s * kfeat, s * N_CONV_OUT), wcg.shape
    H1 = b1.shape[1]
    Apad = w2p.shape[1]

    if block_b is None:
        block_b = _pick_block_b(B)
    assert B % block_b == 0, (B, block_b)
    nb = B // block_b

    patches = _im2col_grouped(x.astype(jnp.float32), s)   # (G, B, s*kfeat) bf16

    kernel = functools.partial(_fused_actor_kernel, n_groups=G)

    flops = int(2 * B * (G * (s * kfeat) * (s * N_CONV_OUT)
                         + G * (s * N_CONV_OUT) * H1
                         + H1 * Apad))
    bytes_accessed = int(
        B * G * s * kfeat * 2                 # patches (bf16, unpadded)
        + wcg.size * 2 + w1g.size * 2         # bf16 weights
        + bcg.size * 4 + b1.size * 4
        + w2p.size * 4 + b2p.size * 4
        + B * Apad * 4)                       # output slab

    out = pl.pallas_call(
        kernel,
        out_shape=jax.ShapeDtypeStruct((B, Apad), jnp.float32),
        grid=(nb,),
        in_specs=[
            pl.BlockSpec((G, block_b, s * kfeat), lambda i: (0, i, 0)),
            _const_spec((s * kfeat, s * N_CONV_OUT), lambda i: (0, 0)),
            _const_spec((1, s * N_CONV_OUT), lambda i: (0, 0)),
            _const_spec((G, s * N_CONV_OUT, H1), lambda i: (0, 0, 0)),
            _const_spec((1, H1), lambda i: (0, 0)),
            _const_spec((H1, Apad), lambda i: (0, 0)),
            _const_spec((1, Apad), lambda i: (0, 0)),
        ],
        out_specs=pl.BlockSpec((block_b, Apad), lambda i: (i, 0)),
        compiler_params=pltpu.CompilerParams(
            dimension_semantics=("parallel",),
            vmem_limit_bytes=32 * 1024 * 1024),
        cost_estimate=pl.CostEstimate(
            flops=flops, transcendentals=0, bytes_accessed=bytes_accessed),
    )(patches, wcg, bcg, w1g, b1, w2p, b2p)

    return out[:, :n_actions]


# ---------------------------------------------------------------------------
# Parameter init (kaiming_normal_ weights, zero biases, as in layer_init)
# ---------------------------------------------------------------------------
def init_params(key, in_channels, spatial, n_actions, *, hidden=HIDDEN,
                n_conv_out=N_CONV_OUT, max_group=8):
    Ho = Wo = spatial - K + 1
    P = Ho * Wo
    kfeat = in_channels * K * K
    s = _pick_group_size(P, max_group)
    G = P // s

    k1, k2, k3 = jax.random.split(key, 3)

    # Conv2d(C, 16, 3): kaiming_normal_ (fan_in = C*9), zero bias; stored bf16.
    w_conv = jax.random.normal(k1, (n_conv_out, in_channels, K, K),
                               jnp.float32) * jnp.sqrt(2.0 / kfeat)
    w_conv_bf = w_conv.astype(jnp.bfloat16)
    b_conv = jnp.zeros((n_conv_out,), jnp.float32)

    # Grouped block-diagonal conv weight:
    #   Wg[j*Kfeat + k, m*OC + c] = (j == m) * w_conv[c, k]
    wc2d = w_conv_bf.astype(jnp.float32).reshape(n_conv_out, kfeat)
    eye = jnp.eye(s, dtype=jnp.float32)
    wcg = jnp.einsum("jm,ck->jkmc", eye, wc2d).reshape(
        s * kfeat, s * n_conv_out).astype(jnp.bfloat16)
    bcg = jnp.tile(b_conv, s).reshape(1, s * n_conv_out)

    # fc1: Linear(OC*P, hidden); stored bf16, rows regrouped so that
    #   w1g[g, j*OC + c, :] == W1[c*P + g*s + j, :]   (NCHW-flatten row order).
    in_dim = n_conv_out * P
    w_fc1 = jax.random.normal(
        k2, (in_dim, hidden), jnp.float32) * jnp.sqrt(2.0 / in_dim)
    w_fc1_bf = w_fc1.astype(jnp.bfloat16)
    w1g = (w_fc1_bf.reshape(n_conv_out, G, s, hidden)
           .transpose(1, 2, 0, 3).reshape(G, s * n_conv_out, hidden))
    b1 = jnp.zeros((1, hidden), jnp.float32)

    # fc_logits: Linear(hidden, A); zero-padded to a 128-lane slab (f32).
    a_pad = ((n_actions + 127) // 128) * 128
    w2 = jax.random.normal(
        k3, (hidden, n_actions), jnp.float32) * jnp.sqrt(2.0 / hidden)
    b2 = jnp.zeros((1, n_actions), jnp.float32)
    w2p = jnp.zeros((hidden, a_pad), jnp.float32).at[:, :n_actions].set(w2)
    b2p = jnp.zeros((1, a_pad), jnp.float32).at[:, :n_actions].set(b2)

    params = dict(wcg=wcg, bcg=bcg, w1g=w1g, b1=b1, w2p=w2p, b2p=b2p,
                  group_size=s, n_actions=n_actions)
    # Reference params keep PyTorch-native layouts (same bf16-rounded values).
    ref_params = (w_conv_bf.astype(jnp.float32), b_conv,
                  w_fc1_bf.astype(jnp.float32), b1, w2, b2)
    return params, ref_params


# ---------------------------------------------------------------------------
# Pure-JAX reference (PyTorch semantics: conv -> flatten(NCHW) -> relu -> fc1
# -> relu -> fc_logits). Mirrors the kernel's bf16 MXU feed of conv weights,
# fc1 weights and the post-ReLU features (intentional fidelity tradeoff; true
# f32 PyTorch parity is ~1e-2 level).
# ---------------------------------------------------------------------------
def reference_forward(x, ref_params):
    w_conv, b_conv, w_fc1, b_fc1, w_out, b_out = ref_params
    conv = lax.conv_general_dilated(
        x.astype(jnp.float32), w_conv,
        window_strides=(1, 1), padding="VALID",
        dimension_numbers=("NCHW", "OIHW", "NCHW"))
    conv = conv + b_conv.reshape(1, -1, 1, 1)
    feat = jnp.maximum(conv.reshape(x.shape[0], -1), 0.0)     # NCHW flatten
    feat = feat.astype(jnp.bfloat16).astype(jnp.float32)       # bf16 MXU feed
    h = jnp.maximum(feat @ w_fc1 + b_fc1, 0.0)
    return h @ w_out + b_out


if __name__ == "__main__":
    key = jax.random.PRNGKey(0)
    kx, kp = jax.random.split(key)

    # MinAtar-like shapes: 4-channel 10x10 binary observations, 6 actions.
    B, C, S, n_actions = 128, 4, 10, 6
    x = jax.random.bernoulli(kx, 0.3, (B, C, S, S)).astype(jnp.float32)

    params, ref_params = init_params(kp, C, S, n_actions)

    # block_b=64 -> 2 grid steps (exercises the batched path and keeps >=2
    # parallel steps for v7x's two TensorCores even at this small batch).
    fwd = jax.jit(lambda inp: actor_forward(inp, params, block_b=64))
    logits = jax.block_until_ready(fwd(x))
    ref = jax.block_until_ready(reference_forward(x, ref_params))

    assert logits.shape == (B, n_actions), logits.shape
    max_err = float(jnp.max(jnp.abs(logits - ref)))
    assert jnp.allclose(logits, ref, atol=5e-3, rtol=5e-3), (
        "mismatch vs reference", max_err)
    print("KERNEL_OK")
</pallas_src>

<mosaic_0001>
module attributes {stable_mosaic.version = 11 : i64} {
  func.func @_fused_actor_kernel(%arg0: i32, %arg1: memref<8x64x288xbf16, #tpu.memory_space<vmem>>, %arg2: memref<288x128xbf16, #tpu.memory_space<vmem>>, %arg3: memref<1x128xf32, #tpu.memory_space<vmem>>, %arg4: memref<8x128x128xbf16, #tpu.memory_space<vmem>>, %arg5: memref<1x128xf32, #tpu.memory_space<vmem>>, %arg6: memref<128x128xf32, #tpu.memory_space<vmem>>, %arg7: memref<1x128xf32, #tpu.memory_space<vmem>>, %arg8: memref<64x128xf32, #tpu.memory_space<vmem>>) attributes {dimension_semantics = [#tpu.dimension_semantics<parallel>], iteration_bounds = array<i64: 2>, scalar_prefetch = 0 : i64, scratch_operands = 0 : i64, tpu.core_type = #tpu.core_type<tc>, window_params = [{transform_indices = @transform_0, window_bounds = array<i64: 8, 64, 288>}, {pipeline_mode = #tpu.pipeline_mode<synchronous>, transform_indices = @transform_1, window_bounds = array<i64: 288, 128>}, {pipeline_mode = #tpu.pipeline_mode<synchronous>, transform_indices = @transform_2, window_bounds = array<i64: 1, 128>}, {pipeline_mode = #tpu.pipeline_mode<synchronous>, transform_indices = @transform_3, window_bounds = array<i64: 8, 128, 128>}, {pipeline_mode = #tpu.pipeline_mode<synchronous>, transform_indices = @transform_4, window_bounds = array<i64: 1, 128>}, {pipeline_mode = #tpu.pipeline_mode<synchronous>, transform_indices = @transform_5, window_bounds = array<i64: 128, 128>}, {pipeline_mode = #tpu.pipeline_mode<synchronous>, transform_indices = @transform_6, window_bounds = array<i64: 1, 128>}, {transform_indices = @transform_7, window_bounds = array<i64: 64, 128>}]} {
    %c0 = arith.constant 0 : index
    %c0_0 = arith.constant 0 : index
    %0 = vector.load %arg2[%c0, %c0_0] : memref<288x128xbf16, #tpu.memory_space<vmem>>, vector<288x128xbf16>
    %c0_1 = arith.constant 0 : index
    %c0_2 = arith.constant 0 : index
    %1 = vector.load %arg3[%c0_1, %c0_2] : memref<1x128xf32, #tpu.memory_space<vmem>>, vector<1x128xf32>
    %cst = arith.constant 0.000000e+00 : f32
    %2 = vector.broadcast %cst : f32 to vector<64x128xf32>
    %c0_3 = arith.constant 0 : index
    %c0_4 = arith.constant 0 : index
    %c0_5 = arith.constant 0 : index
    %3 = vector.load %arg1[%c0_3, %c0_4, %c0_5] : memref<8x64x288xbf16, #tpu.memory_space<vmem>>, vector<1x64x288xbf16>
    %4 = vector.shape_cast %3 : vector<1x64x288xbf16> to vector<64x288xbf16>
    %cst_6 = arith.constant dense<0.000000e+00> : vector<64x128xf32>
    %5 = tpu.matmul %4, %0, %cst_6 {dimension_numbers = #tpu.dot_dimension_numbers<[1], [0], [0], [1], [0, 0, 1, 1], [], []>} : vector<64x288xbf16>, vector<288x128xbf16>, vector<64x128xf32> -> vector<64x128xf32>
    %6 = vector.broadcast %1 : vector<1x128xf32> to vector<64x128xf32>
    %7 = arith.addf %5, %6 : vector<64x128xf32>
    %cst_7 = arith.constant 0.000000e+00 : f32
    %8 = vector.broadcast %cst_7 : f32 to vector<64x128xf32>
    %9 = arith.maximumf %7, %8 : vector<64x128xf32>
    %10 = arith.truncf %9 : vector<64x128xf32> to vector<64x128xbf16>
    %c0_8 = arith.constant 0 : index
    %c0_9 = arith.constant 0 : index
    %c0_10 = arith.constant 0 : index
    %11 = vector.load %arg4[%c0_8, %c0_9, %c0_10] : memref<8x128x128xbf16, #tpu.memory_space<vmem>>, vector<1x128x128xbf16>
    %12 = vector.shape_cast %11 : vector<1x128x128xbf16> to vector<128x128xbf16>
    %cst_11 = arith.constant dense<0.000000e+00> : vector<64x128xf32>
    %13 = tpu.matmul %10, %12, %cst_11 {dimension_numbers = #tpu.dot_dimension_numbers<[1], [0], [0], [1], [0, 0, 1, 1], [], []>} : vector<64x128xbf16>, vector<128x128xbf16>, vector<64x128xf32> -> vector<64x128xf32>
    %14 = arith.addf %2, %13 : vector<64x128xf32>
    %c1 = arith.constant 1 : index
    %c0_12 = arith.constant 0 : index
    %c0_13 = arith.constant 0 : index
    %15 = vector.load %arg1[%c1, %c0_12, %c0_13] : memref<8x64x288xbf16, #tpu.memory_space<vmem>>, vector<1x64x288xbf16>
    %16 = vector.shape_cast %15 : vector<1x64x288xbf16> to vector<64x288xbf16>
    %cst_14 = arith.constant dense<0.000000e+00> : vector<64x128xf32>
    %17 = tpu.matmul %16, %0, %cst_14 {dimension_numbers = #tpu.dot_dimension_numbers<[1], [0], [0], [1], [0, 0, 1, 1], [], []>} : vector<64x288xbf16>, vector<288x128xbf16>, vector<64x128xf32> -> vector<64x128xf32>
    %18 = vector.broadcast %1 : vector<1x128xf32> to vector<64x128xf32>
    %19 = arith.addf %17, %18 : vector<64x128xf32>
    %cst_15 = arith.constant 0.000000e+00 : f32
    %20 = vector.broadcast %cst_15 : f32 to vector<64x128xf32>
    %21 = arith.maximumf %19, %20 : vector<64x128xf32>
    %22 = arith.truncf %21 : vector<64x128xf32> to vector<64x128xbf16>
    %c1_16 = arith.constant 1 : index
    %c0_17 = arith.constant 0 : index
    %c0_18 = arith.constant 0 : index
    %23 = vector.load %arg4[%c1_16, %c0_17, %c0_18] : memref<8x128x128xbf16, #tpu.memory_space<vmem>>, vector<1x128x128xbf16>
    %24 = vector.shape_cast %23 : vector<1x128x128xbf16> to vector<128x128xbf16>
    %cst_19 = arith.constant dense<0.000000e+00> : vector<64x128xf32>
    %25 = tpu.matmul %22, %24, %cst_19 {dimension_numbers = #tpu.dot_dimension_numbers<[1], [0], [0], [1], [0, 0, 1, 1], [], []>} : vector<64x128xbf16>, vector<128x128xbf16>, vector<64x128xf32> -> vector<64x128xf32>
    %26 = arith.addf %14, %25 : vector<64x128xf32>
    %c2 = arith.constant 2 : index
    %c0_20 = arith.constant 0 : index
    %c0_21 = arith.constant 0 : index
    %27 = vector.load %arg1[%c2, %c0_20, %c0_21] : memref<8x64x288xbf16, #tpu.memory_space<vmem>>, vector<1x64x288xbf16>
    %28 = vector.shape_cast %27 : vector<1x64x288xbf16> to vector<64x288xbf16>
    %cst_22 = arith.constant dense<0.000000e+00> : vector<64x128xf32>
    %29 = tpu.matmul %28, %0, %cst_22 {dimension_numbers = #tpu.dot_dimension_numbers<[1], [0], [0], [1], [0, 0, 1, 1], [], []>} : vector<64x288xbf16>, vector<288x128xbf16>, vector<64x128xf32> -> vector<64x128xf32>
    %30 = vector.broadcast %1 : vector<1x128xf32> to vector<64x128xf32>
    %31 = arith.addf %29, %30 : vector<64x128xf32>
    %cst_23 = arith.constant 0.000000e+00 : f32
    %32 = vector.broadcast %cst_23 : f32 to vector<64x128xf32>
    %33 = arith.maximumf %31, %32 : vector<64x128xf32>
    %34 = arith.truncf %33 : vector<64x128xf32> to vector<64x128xbf16>
    %c2_24 = arith.constant 2 : index
    %c0_25 = arith.constant 0 : index
    %c0_26 = arith.constant 0 : index
    %35 = vector.load %arg4[%c2_24, %c0_25, %c0_26] : memref<8x128x128xbf16, #tpu.memory_space<vmem>>, vector<1x128x128xbf16>
    %36 = vector.shape_cast %35 : vector<1x128x128xbf16> to vector<128x128xbf16>
    %cst_27 = arith.constant dense<0.000000e+00> : vector<64x128xf32>
    %37 = tpu.matmul %34, %36, %cst_27 {dimension_numbers = #tpu.dot_dimension_numbers<[1], [0], [0], [1], [0, 0, 1, 1], [], []>} : vector<64x128xbf16>, vector<128x128xbf16>, vector<64x128xf32> -> vector<64x128xf32>
    %38 = arith.addf %26, %37 : vector<64x128xf32>
    %c3 = arith.constant 3 : index
    %c0_28 = arith.constant 0 : index
    %c0_29 = arith.constant 0 : index
    %39 = vector.load %arg1[%c3, %c0_28, %c0_29] : memref<8x64x288xbf16, #tpu.memory_space<vmem>>, vector<1x64x288xbf16>
    %40 = vector.shape_cast %39 : vector<1x64x288xbf16> to vector<64x288xbf16>
    %cst_30 = arith.constant dense<0.000000e+00> : vector<64x128xf32>
    %41 = tpu.matmul %40, %0, %cst_30 {dimension_numbers = #tpu.dot_dimension_numbers<[1], [0], [0], [1], [0, 0, 1, 1], [], []>} : vector<64x288xbf16>, vector<288x128xbf16>, vector<64x128xf32> -> vector<64x128xf32>
    %42 = vector.broadcast %1 : vector<1x128xf32> to vector<64x128xf32>
    %43 = arith.addf %41, %42 : vector<64x128xf32>
    %cst_31 = arith.constant 0.000000e+00 : f32
    %44 = vector.broadcast %cst_31 : f32 to vector<64x128xf32>
    %45 = arith.maximumf %43, %44 : vector<64x128xf32>
    %46 = arith.truncf %45 : vector<64x128xf32> to vector<64x128xbf16>
    %c3_32 = arith.constant 3 : index
    %c0_33 = arith.constant 0 : index
    %c0_34 = arith.constant 0 : index
    %47 = vector.load %arg4[%c3_32, %c0_33, %c0_34] : memref<8x128x128xbf16, #tpu.memory_space<vmem>>, vector<1x128x128xbf16>
    %48 = vector.shape_cast %47 : vector<1x128x128xbf16> to vector<128x128xbf16>
    %cst_35 = arith.constant dense<0.000000e+00> : vector<64x128xf32>
    %49 = tpu.matmul %46, %48, %cst_35 {dimension_numbers = #tpu.dot_dimension_numbers<[1], [0], [0], [1], [0, 0, 1, 1], [], []>} : vector<64x128xbf16>, vector<128x128xbf16>, vector<64x128xf32> -> vector<64x128xf32>
    %50 = arith.addf %38, %49 : vector<64x128xf32>
    %c4 = arith.constant 4 : index
    %c0_36 = arith.constant 0 : index
    %c0_37 = arith.constant 0 : index
    %51 = vector.load %arg1[%c4, %c0_36, %c0_37] : memref<8x64x288xbf16, #tpu.memory_space<vmem>>, vector<1x64x288xbf16>
    %52 = vector.shape_cast %51 : vector<1x64x288xbf16> to vector<64x288xbf16>
    %cst_38 = arith.constant dense<0.000000e+00> : vector<64x128xf32>
    %53 = tpu.matmul %52, %0, %cst_38 {dimension_numbers = #tpu.dot_dimension_numbers<[1], [0], [0], [1], [0, 0, 1, 1], [], []>} : vector<64x288xbf16>, vector<288x128xbf16>, vector<64x128xf32> -> vector<64x128xf32>
    %54 = vector.broadcast %1 : vector<1x128xf32> to vector<64x128xf32>
    %55 = arith.addf %53, %54 : vector<64x128xf32>
    %cst_39 = arith.constant 0.000000e+00 : f32
    %56 = vector.broadcast %cst_39 : f32 to vector<64x128xf32>
    %57 = arith.maximumf %55, %56 : vector<64x128xf32>
    %58 = arith.truncf %57 : vector<64x128xf32> to vector<64x128xbf16>
    %c4_40 = arith.constant 4 : index
    %c0_41 = arith.constant 0 : index
    %c0_42 = arith.constant 0 : index
    %59 = vector.load %arg4[%c4_40, %c0_41, %c0_42] : memref<8x128x128xbf16, #tpu.memory_space<vmem>>, vector<1x128x128xbf16>
    %60 = vector.shape_cast %59 : vector<1x128x128xbf16> to vector<128x128xbf16>
    %cst_43 = arith.constant dense<0.000000e+00> : vector<64x128xf32>
    %61 = tpu.matmul %58, %60, %cst_43 {dimension_numbers = #tpu.dot_dimension_numbers<[1], [0], [0], [1], [0, 0, 1, 1], [], []>} : vector<64x128xbf16>, vector<128x128xbf16>, vector<64x128xf32> -> vector<64x128xf32>
    %62 = arith.addf %50, %61 : vector<64x128xf32>
    %c5 = arith.constant 5 : index
    %c0_44 = arith.constant 0 : index
    %c0_45 = arith.constant 0 : index
    %63 = vector.load %arg1[%c5, %c0_44, %c0_45] : memref<8x64x288xbf16, #tpu.memory_space<vmem>>, vector<1x64x288xbf16>
    %64 = vector.shape_cast %63 : vector<1x64x288xbf16> to vector<64x288xbf16>
    %cst_46 = arith.constant dense<0.000000e+00> : vector<64x128xf32>
    %65 = tpu.matmul %64, %0, %cst_46 {dimension_numbers = #tpu.dot_dimension_numbers<[1], [0], [0], [1], [0, 0, 1, 1], [], []>} : vector<64x288xbf16>, vector<288x128xbf16>, vector<64x128xf32> -> vector<64x128xf32>
    %66 = vector.broadcast %1 : vector<1x128xf32> to vector<64x128xf32>
    %67 = arith.addf %65, %66 : vector<64x128xf32>
    %cst_47 = arith.constant 0.000000e+00 : f32
    %68 = vector.broadcast %cst_47 : f32 to vector<64x128xf32>
    %69 = arith.maximumf %67, %68 : vector<64x128xf32>
    %70 = arith.truncf %69 : vector<64x128xf32> to vector<64x128xbf16>
    %c5_48 = arith.constant 5 : index
    %c0_49 = arith.constant 0 : index
    %c0_50 = arith.constant 0 : index
    %71 = vector.load %arg4[%c5_48, %c0_49, %c0_50] : memref<8x128x128xbf16, #tpu.memory_space<vmem>>, vector<1x128x128xbf16>
    %72 = vector.shape_cast %71 : vector<1x128x128xbf16> to vector<128x128xbf16>
    %cst_51 = arith.constant dense<0.000000e+00> : vector<64x128xf32>
    %73 = tpu.matmul %70, %72, %cst_51 {dimension_numbers = #tpu.dot_dimension_numbers<[1], [0], [0], [1], [0, 0, 1, 1], [], []>} : vector<64x128xbf16>, vector<128x128xbf16>, vector<64x128xf32> -> vector<64x128xf32>
    %74 = arith.addf %62, %73 : vector<64x128xf32>
    %c6 = arith.constant 6 : index
    %c0_52 = arith.constant 0 : index
    %c0_53 = arith.constant 0 : index
    %75 = vector.load %arg1[%c6, %c0_52, %c0_53] : memref<8x64x288xbf16, #tpu.memory_space<vmem>>, vector<1x64x288xbf16>
    %76 = vector.shape_cast %75 : vector<1x64x288xbf16> to vector<64x288xbf16>
    %cst_54 = arith.constant dense<0.000000e+00> : vector<64x128xf32>
    %77 = tpu.matmul %76, %0, %cst_54 {dimension_numbers = #tpu.dot_dimension_numbers<[1], [0], [0], [1], [0, 0, 1, 1], [], []>} : vector<64x288xbf16>, vector<288x128xbf16>, vector<64x128xf32> -> vector<64x128xf32>
    %78 = vector.broadcast %1 : vector<1x128xf32> to vector<64x128xf32>
    %79 = arith.addf %77, %78 : vector<64x128xf32>
    %cst_55 = arith.constant 0.000000e+00 : f32
    %80 = vector.broadcast %cst_55 : f32 to vector<64x128xf32>
    %81 = arith.maximumf %79, %80 : vector<64x128xf32>
    %82 = arith.truncf %81 : vector<64x128xf32> to vector<64x128xbf16>
    %c6_56 = arith.constant 6 : index
    %c0_57 = arith.constant 0 : index
    %c0_58 = arith.constant 0 : index
    %83 = vector.load %arg4[%c6_56, %c0_57, %c0_58] : memref<8x128x128xbf16, #tpu.memory_space<vmem>>, vector<1x128x128xbf16>
    %84 = vector.shape_cast %83 : vector<1x128x128xbf16> to vector<128x128xbf16>
    %cst_59 = arith.constant dense<0.000000e+00> : vector<64x128xf32>
    %85 = tpu.matmul %82, %84, %cst_59 {dimension_numbers = #tpu.dot_dimension_numbers<[1], [0], [0], [1], [0, 0, 1, 1], [], []>} : vector<64x128xbf16>, vector<128x128xbf16>, vector<64x128xf32> -> vector<64x128xf32>
    %86 = arith.addf %74, %85 : vector<64x128xf32>
    %c7 = arith.constant 7 : index
    %c0_60 = arith.constant 0 : index
    %c0_61 = arith.constant 0 : index
    %87 = vector.load %arg1[%c7, %c0_60, %c0_61] : memref<8x64x288xbf16, #tpu.memory_space<vmem>>, vector<1x64x288xbf16>
    %88 = vector.shape_cast %87 : vector<1x64x288xbf16> to vector<64x288xbf16>
    %cst_62 = arith.constant dense<0.000000e+00> : vector<64x128xf32>
    %89 = tpu.matmul %88, %0, %cst_62 {dimension_numbers = #tpu.dot_dimension_numbers<[1], [0], [0], [1], [0, 0, 1, 1], [], []>} : vector<64x288xbf16>, vector<288x128xbf16>, vector<64x128xf32> -> vector<64x128xf32>
    %90 = vector.broadcast %1 : vector<1x128xf32> to vector<64x128xf32>
    %91 = arith.addf %89, %90 : vector<64x128xf32>
    %cst_63 = arith.constant 0.000000e+00 : f32
    %92 = vector.broadcast %cst_63 : f32 to vector<64x128xf32>
    %93 = arith.maximumf %91, %92 : vector<64x128xf32>
    %94 = arith.truncf %93 : vector<64x128xf32> to vector<64x128xbf16>
    %c7_64 = arith.constant 7 : index
    %c0_65 = arith.constant 0 : index
    %c0_66 = arith.constant 0 : index
    %95 = vector.load %arg4[%c7_64, %c0_65, %c0_66] : memref<8x128x128xbf16, #tpu.memory_space<vmem>>, vector<1x128x128xbf16>
    %96 = vector.shape_cast %95 : vector<1x128x128xbf16> to vector<128x128xbf16>
    %cst_67 = arith.constant dense<0.000000e+00> : vector<64x128xf32>
    %97 = tpu.matmul %94, %96, %cst_67 {dimension_numbers = #tpu.dot_dimension_numbers<[1], [0], [0], [1], [0, 0, 1, 1], [], []>} : vector<64x128xbf16>, vector<128x128xbf16>, vector<64x128xf32> -> vector<64x128xf32>
    %98 = arith.addf %86, %97 : vector<64x128xf32>
    %c0_68 = arith.constant 0 : index
    %c0_69 = arith.constant 0 : index
    %99 = vector.load %arg5[%c0_68, %c0_69] : memref<1x128xf32, #tpu.memory_space<vmem>>, vector<1x128xf32>
    %100 = vector.broadcast %99 : vector<1x128xf32> to vector<64x128xf32>
    %101 = arith.addf %98, %100 : vector<64x128xf32>
    %cst_70 = arith.constant 0.000000e+00 : f32
    %102 = vector.broadcast %cst_70 : f32 to vector<64x128xf32>
    %103 = arith.maximumf %101, %102 : vector<64x128xf32>
    %c0_71 = arith.constant 0 : index
    %c0_72 = arith.constant 0 : index
    %104 = vector.load %arg6[%c0_71, %c0_72] : memref<128x128xf32, #tpu.memory_space<vmem>>, vector<128x128xf32>
    %cst_73 = arith.constant dense<0.000000e+00> : vector<64x128xf32>
    %105 = tpu.matmul %103, %104, %cst_73 {dimension_numbers = #tpu.dot_dimension_numbers<[1], [0], [0], [1], [0, 0, 1, 1], [], []>} : vector<64x128xf32>, vector<128x128xf32>, vector<64x128xf32> -> vector<64x128xf32>
    %c0_74 = arith.constant 0 : index
    %c0_75 = arith.constant 0 : index
    %106 = vector.load %arg7[%c0_74, %c0_75] : memref<1x128xf32, #tpu.memory_space<vmem>>, vector<1x128xf32>
    %107 = vector.broadcast %106 : vector<1x128xf32> to vector<64x128xf32>
    %108 = arith.addf %105, %107 : vector<64x128xf32>
    %c0_76 = arith.constant 0 : index
    %c0_77 = arith.constant 0 : index
    %109 = vector.load %arg8[%c0_76, %c0_77] : memref<64x128xf32, #tpu.memory_space<vmem>>, vector<64x128xf32>
    tpu.vector_store %arg8[%c0_76, %c0_77], %108 {strides = array<i32>} : memref<64x128xf32, #tpu.memory_space<vmem>>, vector<64x128xf32>,
    return
  }
  func.func @transform_0(%arg0: i32) -> (i32, i32, i32) {
    %c0_i32 = arith.constant 0 : i32
    %c0_i32_0 = arith.constant 0 : i32
    %c0_i32_1 = arith.constant 0 : i32
    return %c0_i32, %arg0, %c0_i32_0 : i32, i32, i32
  }
  func.func @transform_1(%arg0: i32) -> (i32, i32) {
    %c0_i32 = arith.constant 0 : i32
    %c0_i32_0 = arith.constant 0 : i32
    %c0_i32_1 = arith.constant 0 : i32
    return %c0_i32, %c0_i32_0 : i32, i32
  }
  func.func @transform_2(%arg0: i32) -> (i32, i32) {
    %c0_i32 = arith.constant 0 : i32
    %c0_i32_0 = arith.constant 0 : i32
    %c0_i32_1 = arith.constant 0 : i32
    return %c0_i32, %c0_i32_0 : i32, i32
  }
  func.func @transform_3(%arg0: i32) -> (i32, i32, i32) {
    %c0_i32 = arith.constant 0 : i32
    %c0_i32_0 = arith.constant 0 : i32
    %c0_i32_1 = arith.constant 0 : i32
    %c0_i32_2 = arith.constant 0 : i32
    return %c0_i32, %c0_i32_0, %c0_i32_1 : i32, i32, i32
  }
  func.func @transform_4(%arg0: i32) -> (i32, i32) {
    %c0_i32 = arith.constant 0 : i32
    %c0_i32_0 = arith.constant 0 : i32
    %c0_i32_1 = arith.constant 0 : i32
    return %c0_i32, %c0_i32_0 : i32, i32
  }
  func.func @transform_5(%arg0: i32) -> (i32, i32) {
    %c0_i32 = arith.constant 0 : i32
    %c0_i32_0 = arith.constant 0 : i32
    %c0_i32_1 = arith.constant 0 : i32
    return %c0_i32, %c0_i32_0 : i32, i32
  }
  func.func @transform_6(%arg0: i32) -> (i32, i32) {
    %c0_i32 = arith.constant 0 : i32
    %c0_i32_0 = arith.constant 0 : i32
    %c0_i32_1 = arith.constant 0 : i32
    return %c0_i32, %c0_i32_0 : i32, i32
  }
  func.func @transform_7(%arg0: i32) -> (i32, i32) {
    %c0_i32 = arith.constant 0 : i32
    %c0_i32_0 = arith.constant 0 : i32
    return %arg0, %c0_i32 : i32, i32
  }
}

</mosaic_0001>

<bundles_post_ra>
// kernel: _lambda_.1
= control target key start
LH: loop header
LB: loop body
LE: loop exit
PB: predicated region body
PF: predicated region fallthrough
CT: control target
= control target key end

     0   :  { %s5613_s24 = smov 0   ;;  %s5615_s25 = smov 0   ;;  %s6846_s0 = inlined_call_operand.vmem [shape: bf16[8,128,288], index: 0, kind: input, shape index: {}]   ;;  %s6847_s1 = inlined_call_operand.vmem [shape: bf16[288,128], index: 1, kind: input, shape index: {}]   ;;  %s6848_s2 = inlined_call_operand.vmem [shape: f32[1,128], index: 2, kind: input, shape index: {}, may-alias: {2,4,6}]   ;;  %s6849_s3 = inlined_call_operand.vmem [shape: bf16[8,128,128], index: 3, kind: input, shape index: {}]   ;;  %s6850_s4 = inlined_call_operand.vmem [shape: f32[1,128], index: 4, kind: input, shape index: {}, may-alias: {2,4,6}]   ;;  %s6851_s5 = inlined_call_operand.vmem [shape: f32[128,128], index: 5, kind: input, shape index: {}]   ;;  %s6852_s6 = inlined_call_operand.vmem [shape: f32[1,128], index: 6, kind: input, shape index: {}, may-alias: {2,4,6}]   ;;  %s6853_s7 = inlined_call_operand.vmem [shape: f32[128,128], index: 7, kind: output, shape index: {}]  }
   0x1   :  { %s5617_s26 = smov 0  }
   0x2 LB: > { %s3878_s27 = sadd.s32 4294967295, %s5571_s26   ;;  %s5630_s28 = sadd.s32 1, %s5571_s26   ;;  %s5571_s26 = sphi %s5617_s26, %s6856_s26   ;;  %s5567_s25 = sphi %s5615_s25, %s6855_s25   ;;  %s5563_s24 = sphi %s5613_s24, %s6854_s24  }
   0x3   : > { %s21_s29 = ssub.s32 %s5571_s26, %s5630_s28  ;;  %s24_s30 = sadd.s32 1, %s5567_s25 }
   0x4   : > { %p22_p0 = scmp.eq.s32.totalorder %s21_s29, 0  ;;  %p31_p1 = scmp.ne.s32.totalorder %s5567_s25, %s5563_s24 }
   0x5   : > { %p32_p2 = scmp.eq.s32.totalorder %s5571_s26, 0  ;;  %p3881_p4 = scmp.ge.s32.totalorder %s5571_s26, 2 }
   0x6   : > { %s5639_s8 = scalar_select %p22_p0, %s5567_s25, %s24_s30  }
   0x7   : > { %p33_p3 = por %p32_p2, %p31_p1  ;;  %227 = sbr.rel (%p3881_p4) target bundleno = 91 (0x5b), region = 40 }
   0xc   : > { %230 = sbr.rel (!%p33_p3) target bundleno = 91 (0x5b), region = 44  ;;  %s232_s9 = sand.u32 (%p33_p3), 1, %s5567_s25  }
   0xd   : > { %s5276_s10 = smul.u32 (%p33_p3), 96, %s5571_s26 }
   0xe   : > { %s5275_s11 = smul.u32 (%p33_p3), 768, %s232_s9 }
   0xf   : > { %s5647_s14 = scalar_lea.vmem (%p33_p3), %s6846_s0, %s5276_s10 }
  0x10   : > { %v253_v0 = vld [vmem:[%s5647_s14] sm:$0xff] (%p33_p3)  ;;  %v255_v1 = vld [vmem:[%s5647_s14 + $0xc] sm:$0xff] (%p33_p3)  ;;  %v257_v2 = vld [vmem:[%s5647_s14 + $0x18] sm:$0xff] (%p33_p3)  ;;  %s5652_s15 = scalar_lea.vmem (%p33_p3), [#allocation2], %s5275_s11 }
  0x11   : > { %254 = vst [vmem:[%s5652_s15] sm:$0xff] %v253_v0  ;;  %256 = vst [vmem:[%s5652_s15 + $0xc] sm:$0xff] %v255_v1  ;;  %v259_v3 = vld [vmem:[%s5647_s14 + $0x24] sm:$0xff]  ;;  %v261_v4 = vld [vmem:[%s5647_s14 + $0x30] sm:$0xff] }
  0x12   : > { %258 = vst [vmem:[%s5652_s15 + $0x18] sm:$0xff] %v257_v2  ;;  %v263_v5 = vld [vmem:[%s5647_s14 + $0x3c] sm:$0xff]  ;;  %260 = vst [vmem:[%s5652_s15 + $0x24] sm:$0xff] %v259_v3  ;;  %v265_v6 = vld [vmem:[%s5647_s14 + $0x48] sm:$0xff] }
  0x13   : > { %262 = vst [vmem:[%s5652_s15 + $0x30] sm:$0xff] %v261_v4  ;;  %264 = vst [vmem:[%s5652_s15 + $0x3c] sm:$0xff] %v263_v5  ;;  %v267_v7 = vld [vmem:[%s5647_s14 + $0x54] sm:$0xff]  ;;  %v269_v8 = vld [vmem:[%s5647_s14 + $0xc0] sm:$0xff] }
  0x14   : > { %266 = vst [vmem:[%s5652_s15 + $0x48] sm:$0xff] %v265_v6  ;;  %268 = vst [vmem:[%s5652_s15 + $0x54] sm:$0xff] %v267_v7  ;;  %v271_v9 = vld [vmem:[%s5647_s14 + $0xcc] sm:$0xff]  ;;  %v273_v10 = vld [vmem:[%s5647_s14 + $0xd8] sm:$0xff] }
  0x15   : > { %270 = vst [vmem:[%s5652_s15 + $0x60] sm:$0xff] %v269_v8  ;;  %v275_v11 = vld [vmem:[%s5647_s14 + $0xe4] sm:$0xff]  ;;  %272 = vst [vmem:[%s5652_s15 + $0x6c] sm:$0xff] %v271_v9  ;;  %v277_v12 = vld [vmem:[%s5647_s14 + $0xf0] sm:$0xff] }
  0x16   : > { %274 = vst [vmem:[%s5652_s15 + $0x78] sm:$0xff] %v273_v10  ;;  %276 = vst [vmem:[%s5652_s15 + $0x84] sm:$0xff] %v275_v11  ;;  %v279_v13 = vld [vmem:[%s5647_s14 + $0xfc] sm:$0xff]  ;;  %v281_v14 = vld [vmem:[%s5647_s14 + $0x108] sm:$0xff] }
  0x17   : > { %278 = vst [vmem:[%s5652_s15 + $0x90] sm:$0xff] %v277_v12  ;;  %280 = vst [vmem:[%s5652_s15 + $0x9c] sm:$0xff] %v279_v13  ;;  %v283_v15 = vld [vmem:[%s5647_s14 + $0x114] sm:$0xff]  ;;  %v285_v16 = vld [vmem:[%s5647_s14 + $0x180] sm:$0xff] }
  0x18   : > { %282 = vst [vmem:[%s5652_s15 + $0xa8] sm:$0xff] %v281_v14  ;;  %v287_v17 = vld [vmem:[%s5647_s14 + $0x18c] sm:$0xff]  ;;  %284 = vst [vmem:[%s5652_s15 + $0xb4] sm:$0xff] %v283_v15  ;;  %v289_v18 = vld [vmem:[%s5647_s14 + $0x198] sm:$0xff] }
  0x19   : > { %286 = vst [vmem:[%s5652_s15 + $0xc0] sm:$0xff] %v285_v16  ;;  %288 = vst [vmem:[%s5652_s15 + $0xcc] sm:$0xff] %v287_v17  ;;  %v291_v19 = vld [vmem:[%s5647_s14 + $0x1a4] sm:$0xff]  ;;  %v293_v20 = vld [vmem:[%s5647_s14 + $0x1b0] sm:$0xff] }
  0x1a   : > { %290 = vst [vmem:[%s5652_s15 + $0xd8] sm:$0xff] %v289_v18  ;;  %292 = vst [vmem:[%s5652_s15 + $0xe4] sm:$0xff] %v291_v19  ;;  %v295_v21 = vld [vmem:[%s5647_s14 + $0x1bc] sm:$0xff]  ;;  %v297_v22 = vld [vmem:[%s5647_s14 + $0x1c8] sm:$0xff] }
  0x1b   : > { %294 = vst [vmem:[%s5652_s15 + $0xf0] sm:$0xff] %v293_v20  ;;  %v299_v23 = vld [vmem:[%s5647_s14 + $0x1d4] sm:$0xff]  ;;  %296 = vst [vmem:[%s5652_s15 + $0xfc] sm:$0xff] %v295_v21  ;;  %v301_v24 = vld [vmem:[%s5647_s14 + $0x240] sm:$0xff] }
  0x1c   : > { %298 = vst [vmem:[%s5652_s15 + $0x108] sm:$0xff] %v297_v22  ;;  %300 = vst [vmem:[%s5652_s15 + $0x114] sm:$0xff] %v299_v23  ;;  %v303_v25 = vld [vmem:[%s5647_s14 + $0x24c] sm:$0xff]  ;;  %v305_v26 = vld [vmem:[%s5647_s14 + $0x258] sm:$0xff] }
  0x1d   : > { %302 = vst [vmem:[%s5652_s15 + $0x120] sm:$0xff] %v301_v24  ;;  %304 = vst [vmem:[%s5652_s15 + $0x12c] sm:$0xff] %v303_v25  ;;  %v307_v27 = vld [vmem:[%s5647_s14 + $0x264] sm:$0xff]  ;;  %v309_v28 = vld [vmem:[%s5647_s14 + $0x270] sm:$0xff] }
  0x1e   : > { %306 = vst [vmem:[%s5652_s15 + $0x138] sm:$0xff] %v305_v26  ;;  %v311_v29 = vld [vmem:[%s5647_s14 + $0x27c] sm:$0xff]  ;;  %308 = vst [vmem:[%s5652_s15 + $0x144] sm:$0xff] %v307_v27  ;;  %v313_v30 = vld [vmem:[%s5647_s14 + $0x288] sm:$0xff] }
  0x1f   : > { %310 = vst [vmem:[%s5652_s15 + $0x150] sm:$0xff] %v309_v28  ;;  %312 = vst [vmem:[%s5652_s15 + $0x15c] sm:$0xff] %v311_v29  ;;  %v315_v31 = vld [vmem:[%s5647_s14 + $0x294] sm:$0xff]  ;;  %v317_v32 = vld [vmem:[%s5647_s14 + $0x300] sm:$0xff] }
  0x20   : > { %314 = vst [vmem:[%s5652_s15 + $0x168] sm:$0xff] %v313_v30  ;;  %316 = vst [vmem:[%s5652_s15 + $0x174] sm:$0xff] %v315_v31  ;;  %v319_v33 = vld [vmem:[%s5647_s14 + $0x30c] sm:$0xff]  ;;  %v321_v34 = vld [vmem:[%s5647_s14 + $0x318] sm:$0xff] }
  0x21   : > { %318 = vst [vmem:[%s5652_s15 + $0x180] sm:$0xff] %v317_v32  ;;  %v323_v35 = vld [vmem:[%s5647_s14 + $0x324] sm:$0xff]  ;;  %320 = vst [vmem:[%s5652_s15 + $0x18c] sm:$0xff] %v319_v33  ;;  %v325_v36 = vld [vmem:[%s5647_s14 + $0x330] sm:$0xff] }
  0x22   : > { %322 = vst [vmem:[%s5652_s15 + $0x198] sm:$0xff] %v321_v34  ;;  %324 = vst [vmem:[%s5652_s15 + $0x1a4] sm:$0xff] %v323_v35  ;;  %v327_v37 = vld [vmem:[%s5647_s14 + $0x33c] sm:$0xff]  ;;  %v329_v38 = vld [vmem:[%s5647_s14 + $0x348] sm:$0xff] }
  0x23   : > { %326 = vst [vmem:[%s5652_s15 + $0x1b0] sm:$0xff] %v325_v36  ;;  %328 = vst [vmem:[%s5652_s15 + $0x1bc] sm:$0xff] %v327_v37  ;;  %v331_v39 = vld [vmem:[%s5647_s14 + $0x354] sm:$0xff]  ;;  %v333_v40 = vld [vmem:[%s5647_s14 + $0x3c0] sm:$0xff] }
  0x24   : > { %330 = vst [vmem:[%s5652_s15 + $0x1c8] sm:$0xff] %v329_v38  ;;  %v335_v41 = vld [vmem:[%s5647_s14 + $0x3cc] sm:$0xff]  ;;  %332 = vst [vmem:[%s5652_s15 + $0x1d4] sm:$0xff] %v331_v39  ;;  %v337_v42 = vld [vmem:[%s5647_s14 + $0x3d8] sm:$0xff] }
  0x25   : > { %334 = vst [vmem:[%s5652_s15 + $0x1e0] sm:$0xff] %v333_v40  ;;  %336 = vst [vmem:[%s5652_s15 + $0x1ec] sm:$0xff] %v335_v41  ;;  %v339_v43 = vld [vmem:[%s5647_s14 + $0x3e4] sm:$0xff]  ;;  %v341_v44 = vld [vmem:[%s5647_s14 + $0x3f0] sm:$0xff] }
  0x26   : > { %338 = vst [vmem:[%s5652_s15 + $0x1f8] sm:$0xff] %v337_v42  ;;  %340 = vst [vmem:[%s5652_s15 + $0x204] sm:$0xff] %v339_v43  ;;  %v343_v45 = vld [vmem:[%s5647_s14 + $0x3fc] sm:$0xff]  ;;  %v345_v46 = vld [vmem:[%s5647_s14 + $0x408] sm:$0xff] }
  0x27   : > { %342 = vst [vmem:[%s5652_s15 + $0x210] sm:$0xff] %v341_v44  ;;  %v347_v47 = vld [vmem:[%s5647_s14 + $0x414] sm:$0xff]  ;;  %344 = vst [vmem:[%s5652_s15 + $0x21c] sm:$0xff] %v343_v45  ;;  %v349_v48 = vld [vmem:[%s5647_s14 + $0x480] sm:$0xff] }
  0x28   : > { %346 = vst [vmem:[%s5652_s15 + $0x228] sm:$0xff] %v345_v46  ;;  %348 = vst [vmem:[%s5652_s15 + $0x234] sm:$0xff] %v347_v47  ;;  %v351_v49 = vld [vmem:[%s5647_s14 + $0x48c] sm:$0xff]  ;;  %v353_v50 = vld [vmem:[%s5647_s14 + $0x498] sm:$0xff] }
  0x29   : > { %350 = vst [vmem:[%s5652_s15 + $0x240] sm:$0xff] %v349_v48  ;;  %352 = vst [vmem:[%s5652_s15 + $0x24c] sm:$0xff] %v351_v49  ;;  %v355_v51 = vld [vmem:[%s5647_s14 + $0x4a4] sm:$0xff]  ;;  %v357_v52 = vld [vmem:[%s5647_s14 + $0x4b0] sm:$0xff] }
  0x2a   : > { %354 = vst [vmem:[%s5652_s15 + $0x258] sm:$0xff] %v353_v50  ;;  %v359_v53 = vld [vmem:[%s5647_s14 + $0x4bc] sm:$0xff]  ;;  %356 = vst [vmem:[%s5652_s15 + $0x264] sm:$0xff] %v355_v51  ;;  %v361_v54 = vld [vmem:[%s5647_s14 + $0x4c8] sm:$0xff] }
  0x2b   : > { %358 = vst [vmem:[%s5652_s15 + $0x270] sm:$0xff] %v357_v52  ;;  %360 = vst [vmem:[%s5652_s15 + $0x27c] sm:$0xff] %v359_v53  ;;  %v363_v55 = vld [vmem:[%s5647_s14 + $0x4d4] sm:$0xff]  ;;  %v365_v56 = vld [vmem:[%s5647_s14 + $0x540] sm:$0xff] }
  0x2c   : > { %362 = vst [vmem:[%s5652_s15 + $0x288] sm:$0xff] %v361_v54  ;;  %364 = vst [vmem:[%s5652_s15 + $0x294] sm:$0xff] %v363_v55  ;;  %v367_v57 = vld [vmem:[%s5647_s14 + $0x54c] sm:$0xff]  ;;  %v369_v58 = vld [vmem:[%s5647_s14 + $0x558] sm:$0xff] }
  0x2d   : > { %366 = vst [vmem:[%s5652_s15 + $0x2a0] sm:$0xff] %v365_v56  ;;  %v371_v59 = vld [vmem:[%s5647_s14 + $0x564] sm:$0xff]  ;;  %368 = vst [vmem:[%s5652_s15 + $0x2ac] sm:$0xff] %v367_v57  ;;  %v373_v60 = vld [vmem:[%s5647_s14 + $0x570] sm:$0xff] }
  0x2e   : > { %370 = vst [vmem:[%s5652_s15 + $0x2b8] sm:$0xff] %v369_v58  ;;  %372 = vst [vmem:[%s5652_s15 + $0x2c4] sm:$0xff] %v371_v59  ;;  %v375_v61 = vld [vmem:[%s5647_s14 + $0x57c] sm:$0xff]  ;;  %v377_v62 = vld [vmem:[%s5647_s14 + $0x588] sm:$0xff] }
  0x2f   : > { %374 = vst [vmem:[%s5652_s15 + $0x2d0] sm:$0xff] %v373_v60  ;;  %376 = vst [vmem:[%s5652_s15 + $0x2dc] sm:$0xff] %v375_v61  ;;  %v379_v63 = vld [vmem:[%s5647_s14 + $0x594] sm:$0xff]  ;;  %v3885_v0 = vld [vmem:[%s5647_s14 + $0x8] sm:$0xf] }
  0x30   : > { %378 = vst [vmem:[%s5652_s15 + $0x2e8] sm:$0xff] %v377_v62  ;;  %v3887_v1 = vld [vmem:[%s5647_s14 + $0x14] sm:$0xf]  ;;  %380 = vst [vmem:[%s5652_s15 + $0x2f4] sm:$0xff] %v379_v63  ;;  %v3889_v2 = vld [vmem:[%s5647_s14 + $0x20] sm:$0xf] }
  0x31   : > { %3886 = vst [vmem:[%s5652_s15 + $0x8] sm:$0xf] %v3885_v0  ;;  %3888 = vst [vmem:[%s5652_s15 + $0x14] sm:$0xf] %v3887_v1  ;;  %v3891_v3 = vld [vmem:[%s5647_s14 + $0x2c] sm:$0xf] }
  0x32   : > { %v3893_v4 = vld [vmem:[%s5647_s14 + $0x38] sm:$0xf]  ;;  %3890 = vst [vmem:[%s5652_s15 + $0x20] sm:$0xf] %v3889_v2  ;;  %3892 = vst [vmem:[%s5652_s15 + $0x2c] sm:$0xf] %v3891_v3 }
  0x33   : > { %3894 = vst [vmem:[%s5652_s15 + $0x38] sm:$0xf] %v3893_v4  ;;  %v3895_v5 = vld [vmem:[%s5647_s14 + $0x44] sm:$0xf]  ;;  %v3897_v6 = vld [vmem:[%s5647_s14 + $0x50] sm:$0xf] }
  0x34   : > { %v3899_v7 = vld [vmem:[%s5647_s14 + $0x5c] sm:$0xf]  ;;  %3896 = vst [vmem:[%s5652_s15 + $0x44] sm:$0xf] %v3895_v5  ;;  %3898 = vst [vmem:[%s5652_s15 + $0x50] sm:$0xf] %v3897_v6 }
  0x35   : > { %3900 = vst [vmem:[%s5652_s15 + $0x5c] sm:$0xf] %v3899_v7  ;;  %v3901_v8 = vld [vmem:[%s5647_s14 + $0xc8] sm:$0xf]  ;;  %v3903_v9 = vld [vmem:[%s5647_s14 + $0xd4] sm:$0xf] }
  0x36   : > { %v3905_v10 = vld [vmem:[%s5647_s14 + $0xe0] sm:$0xf]  ;;  %3902 = vst [vmem:[%s5652_s15 + $0x68] sm:$0xf] %v3901_v8  ;;  %3904 = vst [vmem:[%s5652_s15 + $0x74] sm:$0xf] %v3903_v9 }
  0x37   : > { %3906 = vst [vmem:[%s5652_s15 + $0x80] sm:$0xf] %v3905_v10  ;;  %v3907_v11 = vld [vmem:[%s5647_s14 + $0xec] sm:$0xf]  ;;  %v3909_v12 = vld [vmem:[%s5647_s14 + $0xf8] sm:$0xf] }
  0x38   : > { %v3911_v13 = vld [vmem:[%s5647_s14 + $0x104] sm:$0xf]  ;;  %3908 = vst [vmem:[%s5652_s15 + $0x8c] sm:$0xf] %v3907_v11  ;;  %3910 = vst [vmem:[%s5652_s15 + $0x98] sm:$0xf] %v3909_v12 }
  0x39   : > { %3912 = vst [vmem:[%s5652_s15 + $0xa4] sm:$0xf] %v3911_v13  ;;  %v3913_v14 = vld [vmem:[%s5647_s14 + $0x110] sm:$0xf]  ;;  %v3915_v15 = vld [vmem:[%s5647_s14 + $0x11c] sm:$0xf] }
  0x3a   : > { %v3917_v16 = vld [vmem:[%s5647_s14 + $0x188] sm:$0xf]  ;;  %3914 = vst [vmem:[%s5652_s15 + $0xb0] sm:$0xf] %v3913_v14  ;;  %3916 = vst [vmem:[%s5652_s15 + $0xbc] sm:$0xf] %v3915_v15 }
  0x3b   : > { %3918 = vst [vmem:[%s5652_s15 + $0xc8] sm:$0xf] %v3917_v16  ;;  %v3919_v17 = vld [vmem:[%s5647_s14 + $0x194] sm:$0xf]  ;;  %v3921_v18 = vld [vmem:[%s5647_s14 + $0x1a0] sm:$0xf] }
  0x3c   : > { %v3923_v19 = vld [vmem:[%s5647_s14 + $0x1ac] sm:$0xf]  ;;  %3920 = vst [vmem:[%s5652_s15 + $0xd4] sm:$0xf] %v3919_v17  ;;  %3922 = vst [vmem:[%s5652_s15 + $0xe0] sm:$0xf] %v3921_v18 }
  0x3d   : > { %3924 = vst [vmem:[%s5652_s15 + $0xec] sm:$0xf] %v3923_v19  ;;  %v3925_v20 = vld [vmem:[%s5647_s14 + $0x1b8] sm:$0xf]  ;;  %v3927_v21 = vld [vmem:[%s5647_s14 + $0x1c4] sm:$0xf] }
  0x3e   : > { %v3929_v22 = vld [vmem:[%s5647_s14 + $0x1d0] sm:$0xf]  ;;  %3926 = vst [vmem:[%s5652_s15 + $0xf8] sm:$0xf] %v3925_v20  ;;  %3928 = vst [vmem:[%s5652_s15 + $0x104] sm:$0xf] %v3927_v21 }
  0x3f   : > { %3930 = vst [vmem:[%s5652_s15 + $0x110] sm:$0xf] %v3929_v22  ;;  %v3931_v23 = vld [vmem:[%s5647_s14 + $0x1dc] sm:$0xf]  ;;  %v3933_v24 = vld [vmem:[%s5647_s14 + $0x248] sm:$0xf] }
  0x40   : > { %v3935_v25 = vld [vmem:[%s5647_s14 + $0x254] sm:$0xf]  ;;  %3932 = vst [vmem:[%s5652_s15 + $0x11c] sm:$0xf] %v3931_v23  ;;  %3934 = vst [vmem:[%s5652_s15 + $0x128] sm:$0xf] %v3933_v24 }
  0x41   : > { %3936 = vst [vmem:[%s5652_s15 + $0x134] sm:$0xf] %v3935_v25  ;;  %v3937_v26 = vld [vmem:[%s5647_s14 + $0x260] sm:$0xf]  ;;  %v3939_v27 = vld [vmem:[%s5647_s14 + $0x26c] sm:$0xf] }
  0x42   : > { %v3941_v28 = vld [vmem:[%s5647_s14 + $0x278] sm:$0xf]  ;;  %3938 = vst [vmem:[%s5652_s15 + $0x140] sm:$0xf] %v3937_v26  ;;  %3940 = vst [vmem:[%s5652_s15 + $0x14c] sm:$0xf] %v3939_v27 }
  0x43   : > { %3942 = vst [vmem:[%s5652_s15 + $0x158] sm:$0xf] %v3941_v28  ;;  %v3943_v29 = vld [vmem:[%s5647_s14 + $0x284] sm:$0xf]  ;;  %v3945_v30 = vld [vmem:[%s5647_s14 + $0x290] sm:$0xf] }
  0x44   : > { %v3947_v31 = vld [vmem:[%s5647_s14 + $0x29c] sm:$0xf]  ;;  %3944 = vst [vmem:[%s5652_s15 + $0x164] sm:$0xf] %v3943_v29  ;;  %3946 = vst [vmem:[%s5652_s15 + $0x170] sm:$0xf] %v3945_v30 }
  0x45   : > { %3948 = vst [vmem:[%s5652_s15 + $0x17c] sm:$0xf] %v3947_v31  ;;  %v3949_v32 = vld [vmem:[%s5647_s14 + $0x308] sm:$0xf]  ;;  %v3951_v33 = vld [vmem:[%s5647_s14 + $0x314] sm:$0xf] }
  0x46   : > { %v3953_v34 = vld [vmem:[%s5647_s14 + $0x320] sm:$0xf]  ;;  %3950 = vst [vmem:[%s5652_s15 + $0x188] sm:$0xf] %v3949_v32  ;;  %3952 = vst [vmem:[%s5652_s15 + $0x194] sm:$0xf] %v3951_v33 }
  0x47   : > { %3954 = vst [vmem:[%s5652_s15 + $0x1a0] sm:$0xf] %v3953_v34  ;;  %v3955_v35 = vld [vmem:[%s5647_s14 + $0x32c] sm:$0xf]  ;;  %v3957_v36 = vld [vmem:[%s5647_s14 + $0x338] sm:$0xf] }
  0x48   : > { %v3959_v37 = vld [vmem:[%s5647_s14 + $0x344] sm:$0xf]  ;;  %3956 = vst [vmem:[%s5652_s15 + $0x1ac] sm:$0xf] %v3955_v35  ;;  %3958 = vst [vmem:[%s5652_s15 + $0x1b8] sm:$0xf] %v3957_v36 }
  0x49   : > { %3960 = vst [vmem:[%s5652_s15 + $0x1c4] sm:$0xf] %v3959_v37  ;;  %v3961_v38 = vld [vmem:[%s5647_s14 + $0x350] sm:$0xf]  ;;  %v3963_v39 = vld [vmem:[%s5647_s14 + $0x35c] sm:$0xf] }
  0x4a   : > { %v3965_v40 = vld [vmem:[%s5647_s14 + $0x3c8] sm:$0xf]  ;;  %3962 = vst [vmem:[%s5652_s15 + $0x1d0] sm:$0xf] %v3961_v38  ;;  %3964 = vst [vmem:[%s5652_s15 + $0x1dc] sm:$0xf] %v3963_v39 }
  0x4b   : > { %3966 = vst [vmem:[%s5652_s15 + $0x1e8] sm:$0xf] %v3965_v40  ;;  %v3967_v41 = vld [vmem:[%s5647_s14 + $0x3d4] sm:$0xf]  ;;  %v3969_v42 = vld [vmem:[%s5647_s14 + $0x3e0] sm:$0xf] }
  0x4c   : > { %v3971_v43 = vld [vmem:[%s5647_s14 + $0x3ec] sm:$0xf]  ;;  %3968 = vst [vmem:[%s5652_s15 + $0x1f4] sm:$0xf] %v3967_v41  ;;  %3970 = vst [vmem:[%s5652_s15 + $0x200] sm:$0xf] %v3969_v42 }
  0x4d   : > { %3972 = vst [vmem:[%s5652_s15 + $0x20c] sm:$0xf] %v3971_v43  ;;  %v3973_v44 = vld [vmem:[%s5647_s14 + $0x3f8] sm:$0xf]  ;;  %v3975_v45 = vld [vmem:[%s5647_s14 + $0x404] sm:$0xf] }
  0x4e   : > { %v3977_v46 = vld [vmem:[%s5647_s14 + $0x410] sm:$0xf]  ;;  %3974 = vst [vmem:[%s5652_s15 + $0x218] sm:$0xf] %v3973_v44  ;;  %3976 = vst [vmem:[%s5652_s15 + $0x224] sm:$0xf] %v3975_v45 }
  0x4f   : > { %3978 = vst [vmem:[%s5652_s15 + $0x230] sm:$0xf] %v3977_v46  ;;  %v3979_v47 = vld [vmem:[%s5647_s14 + $0x41c] sm:$0xf]  ;;  %v3981_v48 = vld [vmem:[%s5647_s14 + $0x488] sm:$0xf] }
  0x50   : > { %v3983_v49 = vld [vmem:[%s5647_s14 + $0x494] sm:$0xf]  ;;  %3980 = vst [vmem:[%s5652_s15 + $0x23c] sm:$0xf] %v3979_v47  ;;  %3982 = vst [vmem:[%s5652_s15 + $0x248] sm:$0xf] %v3981_v48 }
  0x51   : > { %3984 = vst [vmem:[%s5652_s15 + $0x254] sm:$0xf] %v3983_v49  ;;  %v3985_v50 = vld [vmem:[%s5647_s14 + $0x4a0] sm:$0xf]  ;;  %v3987_v51 = vld [vmem:[%s5647_s14 + $0x4ac] sm:$0xf] }
  0x52   : > { %v3989_v52 = vld [vmem:[%s5647_s14 + $0x4b8] sm:$0xf]  ;;  %3986 = vst [vmem:[%s5652_s15 + $0x260] sm:$0xf] %v3985_v50  ;;  %3988 = vst [vmem:[%s5652_s15 + $0x26c] sm:$0xf] %v3987_v51 }
  0x53   : > { %3990 = vst [vmem:[%s5652_s15 + $0x278] sm:$0xf] %v3989_v52  ;;  %v3991_v53 = vld [vmem:[%s5647_s14 + $0x4c4] sm:$0xf]  ;;  %v3993_v54 = vld [vmem:[%s5647_s14 + $0x4d0] sm:$0xf] }
  0x54   : > { %v3995_v55 = vld [vmem:[%s5647_s14 + $0x4dc] sm:$0xf]  ;;  %3992 = vst [vmem:[%s5652_s15 + $0x284] sm:$0xf] %v3991_v53  ;;  %3994 = vst [vmem:[%s5652_s15 + $0x290] sm:$0xf] %v3993_v54 }
  0x55   : > { %3996 = vst [vmem:[%s5652_s15 + $0x29c] sm:$0xf] %v3995_v55  ;;  %v3997_v56 = vld [vmem:[%s5647_s14 + $0x548] sm:$0xf]  ;;  %v3999_v57 = vld [vmem:[%s5647_s14 + $0x554] sm:$0xf] }
  0x56   : > { %v4001_v58 = vld [vmem:[%s5647_s14 + $0x560] sm:$0xf]  ;;  %3998 = vst [vmem:[%s5652_s15 + $0x2a8] sm:$0xf] %v3997_v56  ;;  %4000 = vst [vmem:[%s5652_s15 + $0x2b4] sm:$0xf] %v3999_v57 }
  0x57   : > { %4002 = vst [vmem:[%s5652_s15 + $0x2c0] sm:$0xf] %v4001_v58  ;;  %v4003_v59 = vld [vmem:[%s5647_s14 + $0x56c] sm:$0xf]  ;;  %v4005_v60 = vld [vmem:[%s5647_s14 + $0x578] sm:$0xf] }
  0x58   : > { %v4007_v61 = vld [vmem:[%s5647_s14 + $0x584] sm:$0xf]  ;;  %4004 = vst [vmem:[%s5652_s15 + $0x2cc] sm:$0xf] %v4003_v59  ;;  %4006 = vst [vmem:[%s5652_s15 + $0x2d8] sm:$0xf] %v4005_v60 }
  0x59   : > { %4008 = vst [vmem:[%s5652_s15 + $0x2e4] sm:$0xf] %v4007_v61  ;;  %v4009_v62 = vld [vmem:[%s5647_s14 + $0x590] sm:$0xf]  ;;  %v4011_v63 = vld [vmem:[%s5647_s14 + $0x59c] sm:$0xf] }
  0x5a   : > { %4010 = vst [vmem:[%s5652_s15 + $0x2f0] sm:$0xf] %v4009_v62  ;;  %4012 = vst [vmem:[%s5652_s15 + $0x2fc] sm:$0xf] %v4011_v63 }
  0x5b PF: > { %p4013_p5 = scmp.ge.s32.totalorder %s5571_s26, 1  ;;  %p521_p6 = scmp.lt.s32.totalorder %s5571_s26, 3 }
  0x5d   : > { %p522_p7 = pnand %p4013_p5, %p521_p6 }
  0x5e   : > { %s528_s18 = sand.u32 (!%p522_p7), 1, %s5563_s24   ;;  %s4014_s16 = sshll.u32 (!%p522_p7), %s3878_s27, 3 }
  0x5f   : > { %525 = sbr.rel (%p522_p7) target bundleno = 2153 (0x869), region = 70  ;;  %p561_p8 = scmp.lt.s32.totalorder (!%p522_p7), %s4014_s16, 15 }
  0x60   : > { %s5277_s30 = smul.u32 (!%p522_p7), 768, %s528_s18 }
  0x62   : > { %s5950_s20 = scalar_lea.vmem (!%p522_p7), [#allocation2], %s5277_s30 }
  0x64   : > { %v5912_v0 = vld [vmem:[%s6847_s1 + $0x78] sm:$0xff]   ;;  %v5304_v2 = vld [vmem:[%s6847_s1 + $0x70] sm:$0xff]   ;;  %v5928_v4 = vld [vmem:[%s6847_s1 + $0x88] sm:$0xff]   ;;  %vm794_vm0 = vcmask 261120   ;;  %s6858_s16 = smov (!%p561_p8, %s4014_s16), 15 }
  0x65   : > { %v5303_v1 = vld [vmem:[%s6847_s1 + $0x38] sm:$0xff]   ;;  %4455 = vmatprep.subr.bf16.mxu0 %v5912_v0  ;;  %v5305_v3 = vld [vmem:[%s6847_s1 + $0x30] sm:$0xff]   ;;  %v5307_v5 = vld [vmem:[%s6847_s1 + $0x68] sm:$0xff]   ;;  %4943 = vmatprep.subr.bf16.mxu1 %v5928_v4  ;;  %s4015_s17 = sshll.u32 %s6858_s16, 3 }
  0x66   : > { %4456 = vmatpush3.bf16.msra.mxu0 %v5303_v1  ;;  %v5308_v6 = vld [vmem:[%s6847_s1 + $0x28] sm:$0xff]   ;;  %4944 = vmatpush3.bf16.msra.mxu1 %v5928_v4  ;;  %v5941_v7 = vld [vmem:[%s6847_s1 + $0x80] sm:$0xff]   ;;  %v5314_v12 = vld [vmem:[%s6847_s1 + $0x58] sm:$0xff]   ;;  %s564_s23 = scalar_lea.vmem %s6853_s7, %s4015_s17 }
  0x67   : > { %4457 = vmatprep.subr.bf16.mxu0 %v5304_v2  ;;  %v5310_v8 = vld [vmem:[%s6847_s1 + $0x60] sm:$0xff]   ;;  %4945 = vmatprep.subr.bf16.mxu1 %v5941_v7  ;;  %v5312_v10 = vld [vmem:[%s5950_s20 + $0x8] ss:$12 sps:$4 sm:$0xff]   ;;  %v5315_v13 = vld [vmem:[%s6847_s1 + $0x18] sm:$0xff]  }
  0x68   : > { %v5311_v9 = vld [vmem:[%s6847_s1 + $0x20] sm:$0xff]   ;;  %4947 = vmatprep.mubr.msk.bf16.mxu1 %vm794_vm0, %v5312_v10  ;;  %v5316_v14 = vld [vmem:[%s6847_s1 + $0x50] sm:$0xff]   ;;  %v5318_v16 = vld [vmem:[%s6847_s1 + $0x48] sm:$0xff]  }
  0x69   : > { %v5313_v11 = vld [vmem:[%s5950_s20 + $0x20] ss:$12 sps:$4 sm:$0xff]   ;;  %v5317_v15 = vld [vmem:[%s6847_s1 + $0x10] sm:$0xff]   ;;  %v5325_v19 = vld [vmem:[%s5950_s20 + $0x38] ss:$12 sps:$4 sm:$0xff]  }
  0x6a   : > { %4458 = vmatpush3.bf16.msra.mxu0 %v5305_v3  ;;  %4946 = vmatpush3.bf16.msra.mxu1 %v5941_v7  ;;  %v5319_v17 = vld [vmem:[%s6847_s1 + $0x8] sm:$0xff]   ;;  %v5324_v18 = vld [vmem:[%s5950_s20 + $0x4] ss:$12 sps:$4 sm:$0xff]   ;;  %v5333_v27 = vld [vmem:[%s5950_s20 + $0x34] ss:$12 sps:$4 sm:$0xff]  }
  0x6b   : > { %4459 = vmatprep.subr.bf16.mxu0 %v5307_v5  ;;  %4501 = vmatprep.subr.bf16.mxu1 %v5912_v0  ;;  %v5326_v20 = vld [vmem:[%s5950_s20 + $0x50] ss:$12 sps:$4 sm:$0xff]   ;;  %v5320_v21 = vld [vmem:[%s6847_s1 + $0x40] sm:$0xff]   ;;  %v5339_v31 = vld [vmem:[%s5950_s20 + $0x4c] ss:$12 sps:$4 sm:$0xff]  }
  0x6c   : > { %839 = vmatprep.mubr.bf16.mxu0 %v5324_v18  ;;  %v5332_v22 = vld [vmem:[%s5950_s20 + $0x64] ss:$12 sps:$4 sm:$0xff]   ;;  %v5322_v24 = vld [vmem:[%s5950_s20] ss:$12 sps:$4 sm:$0xff]   ;;  %v5327_v25 = vld [vmem:[%s5950_s20 + $0x1c] ss:$12 sps:$4 sm:$0xff]  }
  0x6d   : > { %4948 = vmatmul.mubr.msk.bf16.vlgmr.msra.gmra.mxu1 %vm794_vm0, %v5313_v11  ;;  %v5321_v23 = vld [vmem:[%s6847_s1] sm:$0xff]   ;;  %v5336_v29 = vld [vmem:[%s5950_s20 + $0x7c] ss:$12 sps:$4 sm:$0xff]   ;;  %v5347_v37 = vld [vmem:[%s5950_s20 + $0xac] ss:$12 sps:$4 sm:$0xff]  }
  0x6e   : > { %4460 = vmatpush3.bf16.msra.mxu0 %v5308_v6  ;;  %4502 = vmatpush3.bf16.msra.mxu1 %v5303_v1  ;;  %v5329_v26 = vld [vmem:[%s5950_s20 + $0x18] ss:$12 sps:$4 sm:$0xff]   ;;  %v5330_v28 = vld [vmem:[%s5950_s20 + $0x60] ss:$12 sps:$4 sm:$0xff]   ;;  %v5335_v30 = vld [vmem:[%s5950_s20 + $0x30] ss:$12 sps:$4 sm:$0xff]  }
  0x6f   : > { %4461 = vmatprep.subr.bf16.mxu0 %v5310_v8  ;;  %4503 = vmatprep.subr.bf16.mxu1 %v5304_v2  ;;  %v5338_v32 = vld [vmem:[%s5950_s20 + $0x78] ss:$12 sps:$4 sm:$0xff]   ;;  %v5342_v33 = vld [vmem:[%s5950_s20 + $0x94] ss:$12 sps:$4 sm:$0xff]   ;;  %v5344_v36 = vld [vmem:[%s5950_s20 + $0x90] ss:$12 sps:$4 sm:$0xff]  }
  0x70   : > { %4951 = vmatprep.mubr.msk.bf16.mxu1 %vm794_vm0, %v5325_v19  ;;  %v5341_v34 = vld [vmem:[%s5950_s20 + $0x48] ss:$12 sps:$4 sm:$0xff]   ;;  %v5346_v38 = vld [vmem:[%s5950_s20 + $0x80] ss:$12 sps:$4 sm:$0xff]   ;;  %v5350_v39 = vld [vmem:[%s5950_s20 + $0x98] ss:$12 sps:$4 sm:$0xff]  }
  0x71   : > { %v5345_v35 = vld [vmem:[%s5950_s20 + $0x68] ss:$12 sps:$4 sm:$0xff]   ;;  %v5351_v41 = vld [vmem:[%s5950_s20 + $0xb0] ss:$12 sps:$4 sm:$0xff]   ;;  %v5355_v45 = vld [vmem:[%s6849_s3 + $0x20] sm:$0xff]  }
  0x72   : > { %4462 = vmatpush3.bf16.msra.mxu0 %v5311_v9  ;;  %4504 = vmatpush3.bf16.msra.mxu1 %v5305_v3  ;;  %v5349_v40 = vld [vmem:[%s5950_s20 + $0xa8] ss:$12 sps:$4 sm:$0xff]   ;;  %v5352_v42 = vld [vmem:[%s6849_s3 + $0x38] sm:$0xff]   ;;  %v5362_v52 = vld [vmem:[%s6849_s3] sm:$0xff]  }
  0x73   : > { %4463 = vmatprep.subr.bf16.mxu0 %v5314_v12  ;;  %4505 = vmatprep.subr.bf16.mxu1 %v5307_v5  ;;  %v5353_v43 = vld [vmem:[%s6849_s3 + $0x30] sm:$0xff]   ;;  %v5354_v44 = vld [vmem:[%s6849_s3 + $0x28] sm:$0xff]   ;;  %v5356_v46 = vld [vmem:[%s6849_s3 + $0x18] sm:$0xff]  }
  0x74   : > { %v5357_v47 = vld [vmem:[%s6849_s3 + $0x78] sm:$0xff]   ;;  %v5358_v48 = vld [vmem:[%s6849_s3 + $0x10] sm:$0xff]   ;;  %v5360_v50 = vld [vmem:[%s6849_s3 + $0x8] sm:$0xff]  }
  0x75   : > { %4952 = vmatmul.mubr.msk.bf16.gmra.mxu1 %vm794_vm0, %v5326_v20  ;;  %v5359_v49 = vld [vmem:[%s6849_s3 + $0x70] sm:$0xff]   ;;  %v5361_v51 = vld [vmem:[%s6849_s3 + $0x68] sm:$0xff]   ;;  %v5363_v53 = vld [vmem:[%s6849_s3 + $0x60] sm:$0xff]  }
  0x76   : > { %4464 = vmatpush3.bf16.msra.mxu0 %v5315_v13  ;;  %4506 = vmatpush3.bf16.msra.mxu1 %v5308_v6  ;;  %v5364_v54 = vld [vmem:[%s6849_s3 + $0x58] sm:$0xff]   ;;  %v5365_v55 = vld [vmem:[%s6849_s3 + $0x50] sm:$0xff]   ;;  %v5366_v56 = vld [vmem:[%s6849_s3 + $0x48] sm:$0xff]  }
  0x77   : > { %4465 = vmatprep.subr.bf16.mxu0 %v5316_v14  ;;  %4507 = vmatprep.subr.bf16.mxu1 %v5310_v8  ;;  %v5367_v57 = vld [vmem:[%s6849_s3 + $0x40] sm:$0xff]  }
  0x78   : > { %1086 = vmatprep.mubr.bf16.mxu1 %v5332_v22  ;;  %v6069_v2 = vld [vmem:[%s6848_s2] ss:$0 sm:$0xff] }
  0x7a   : > { %4466 = vmatpush3.bf16.msra.mxu0 %v5317_v15  ;;  %4508 = vmatpush3.bf16.msra.mxu1 %v5311_v9 }
  0x7b   : > { %4467 = vmatprep.subr.bf16.mxu0 %v5318_v16  ;;  %4509 = vmatprep.subr.bf16.mxu1 %v5314_v12 }
  0x7e   : > { %4468 = vmatpush3.bf16.msra.mxu0 %v5319_v17  ;;  %4510 = vmatpush3.bf16.msra.mxu1 %v5315_v13 }
  0x7f   : > { %4469 = vmatprep.subr.bf16.mxu0 %v5320_v21  ;;  %4511 = vmatprep.subr.bf16.mxu1 %v5316_v14 }
  0x82   : > { %4470 = vmatpush3.bf16.msra.mxu0 %v5321_v23  ;;  %4512 = vmatpush3.bf16.msra.mxu1 %v5317_v15 }
  0x83   : > { %4955 = vmatprep.subr.bf16.mxu0 %v5928_v4  ;;  %4513 = vmatprep.subr.bf16.mxu1 %v5318_v16 }
  0x85   : > { %840 = vmatmul.mubr.bf16.vlgmr.msra.gmra.mxu0 %v5322_v24 }
  0x86   : > { %4956 = vmatpush3.bf16.msra.mxu0 %v5928_v4  ;;  %847 = vmatprep.mubr.bf16.mxu0 %v5327_v25 }
  0x87   : > { %4957 = vmatprep.subr.bf16.mxu0 %v5941_v7  ;;  %4514 = vmatpush3.bf16.msra.mxu1 %v5319_v17 }
  0x88   : > { %4515 = vmatprep.subr.bf16.mxu1 %v5320_v21 }
  0x8a   : > { %4958 = vmatpush3.bf16.msra.mxu0 %v5941_v7 }
  0x8b   : > { %4516 = vmatpush3.bf16.msra.mxu1 %v5321_v23  ;;  %4991 = vmatprep.subr.bf16.mxu0 %v5352_v42 }
  0x8c   : > { %4967 = vmatprep.subr.bf16.mxu1 %v5357_v47 }
  0x8d   : > { %848 = vmatmul.mubr.bf16.gmra.mxu0 %v5329_v26 }
  0x8e   : > { %855 = vmatprep.mubr.bf16.mxu0 %v5333_v27  ;;  %1087 = vmatmul.mubr.bf16.vlgmr.msra.gmra.mxu1 %v5330_v28 }
  0x8f   : > { %1094 = vmatprep.mubr.bf16.mxu1 %v5336_v29  ;;  %4968 = vmatpush3.bf16.msra.mxu1 %v5357_v47 }
  0x90   : > { %4969 = vmatprep.subr.bf16.mxu1 %v5359_v49 }
  0x93   : > { %4970 = vmatpush3.bf16.msra.mxu1 %v5359_v49 }
  0x94   : > { %4971 = vmatprep.subr.bf16.mxu1 %v5361_v51 }
  0x95   : > { %856 = vmatmul.mubr.bf16.gmra.mxu0 %v5335_v30 }
  0x96   : > { %863 = vmatprep.mubr.bf16.mxu0 %v5339_v31  ;;  %1095 = vmatmul.mubr.bf16.gmra.mxu1 %v5338_v32 }
  0x97   : > { %1102 = vmatprep.mubr.bf16.mxu1 %v5342_v33  ;;  %4972 = vmatpush3.bf16.msra.mxu1 %v5361_v51 }
  0x98   : > { %4973 = vmatprep.subr.bf16.mxu1 %v5363_v53 }
  0x9b   : > { %4974 = vmatpush3.bf16.msra.mxu1 %v5363_v53 }
  0x9c   : > { %4975 = vmatprep.subr.bf16.mxu1 %v5364_v54 }
  0x9d   : > { %864 = vmatmul.mubr.bf16.gmra.mxu0 %v5341_v34 }
  0x9e   : > { %4959 = vmatprep.mubr.msk.bf16.mxu0 %vm794_vm0, %v5345_v35  ;;  %1103 = vmatmul.mubr.bf16.gmra.mxu1 %v5344_v36 }
  0x9f   : > { %1110 = vmatprep.mubr.bf16.mxu1 %v5347_v37  ;;  %4976 = vmatpush3.bf16.msra.mxu1 %v5364_v54 }
  0xa0   : > { %4977 = vmatprep.subr.bf16.mxu1 %v5365_v55 }
  0xa3   : > { %4978 = vmatpush3.bf16.msra.mxu1 %v5365_v55 }
  0xa4   : > { %4979 = vmatprep.subr.bf16.mxu1 %v5366_v56 }
  0xa5   : > { %4960 = vmatmul.mubr.msk.bf16.vlgmr.msra.gmra.mxu0 %vm794_vm0, %v5346_v38 }
  0xa6   : > { %4963 = vmatprep.mubr.msk.bf16.mxu0 %vm794_vm0, %v5350_v39  ;;  %1111 = vmatmul.mubr.bf16.gmra.mxu1 %v5349_v40 }
  0xa7   : > { %4992 = vmatpush3.bf16.msra.mxu0 %v5352_v42  ;;  %4980 = vmatpush3.bf16.msra.mxu1 %v5366_v56 }
  0xa8   : > { %4993 = vmatprep.subr.bf16.mxu0 %v5353_v43  ;;  %4981 = vmatprep.subr.bf16.mxu1 %v5367_v57 }
  0xab   : > { %4994 = vmatpush3.bf16.msra.mxu0 %v5353_v43  ;;  %4982 = vmatpush3.bf16.msra.mxu1 %v5367_v57 }
  0xac   : > { %4995 = vmatprep.subr.bf16.mxu0 %v5354_v44  ;;  %4571 = vmatprep.subr.bf16.mxu1 %v5912_v0 }
  0xad   : > { %4964 = vmatmul.mubr.msk.bf16.gmra.mxu0 %vm794_vm0, %v5351_v41 }
  0xaf   : > { %4996 = vmatpush3.bf16.msra.mxu0 %v5354_v44 }
  0xb0   : > { %4997 = vmatprep.subr.bf16.mxu0 %v5355_v45 }
  0xb3   : > { %4998 = vmatpush3.bf16.msra.mxu0 %v5355_v45 }
  0xb4   : > { %4999 = vmatprep.subr.bf16.mxu0 %v5356_v46 }
  0xb7   : > { %5000 = vmatpush3.bf16.msra.mxu0 %v5356_v46 }
  0xb8   : > { %5001 = vmatprep.subr.bf16.mxu0 %v5358_v48 }
  0xbb   : > { %5002 = vmatpush3.bf16.msra.mxu0 %v5358_v48 }
  0xbc   : > { %5003 = vmatprep.subr.bf16.mxu0 %v5360_v50 }
  0xbf   : > { %5004 = vmatpush3.bf16.msra.mxu0 %v5360_v50 }
  0xc0   : > { %5005 = vmatprep.subr.bf16.mxu0 %v5362_v52 }
  0xc3   : > { %5006 = vmatpush3.bf16.msra.mxu0 %v5362_v52 }
  0xc4   : > { %5015 = vmatprep.subr.bf16.mxu0 %v5928_v4 }
 0x12d   : > { %v4949_v58 = vpop.f32.mrf.mxu1 }
 0x12f   : > { %v906_v59 = vpop.f32.mrf.mxu1 }
 0x131   : > { %v4950_v60 = vpop.f32.mrf.mxu1 }
 0x133   : > { %v909_v61 = vpop.f32.mrf.mxu1 }
 0x135   : > { %v6064_v62 = vpop.f32.mrf.mxu1 }
 0x137   : > { %v922_v1 = vpop.f32.mrf.mxu1 }
 0x139   : > { %v6071_v8 = vpop.f32.mrf.mxu1 }
 0x13b   : > { %v925_v12 = vpop.f32.mrf.mxu1 }
 0x145   : > { %v4471_v63 = vpop.f32.mrf.mxu0 }
 0x147   : > { %v4472_v3 = vpop.f32.mrf.mxu0 }
 0x148   : > { %v4473_v5 = vadd.f32 %v4472_v3, %v4471_v63 }
 0x149   : > { %v4474_v6 = vpop.f32.mrf.mxu0 }
 0x14a   : > { %v842_v0 = vadd.f32 %v4473_v5, %v6069_v2 }
 0x14b   : > { %v4475_v9 = vpop.f32.mrf.mxu0 }
 0x14c   : > { %v4476_v10 = vadd.f32 %v4475_v9, %v4474_v6  ;;  %v907_v13 = vadd.f32 %v906_v59, %v842_v0 }
 0x14d   : > { %v4477_v11 = vpop.f32.mrf.mxu0 }
 0x14e   : > { %v845_v14 = vadd.f32 %v4476_v10, %v6069_v2  ;;  %v4517_v19 = vpop.f32.mrf.mxu1  ;;  %v937_v20 = vmax.f32 %v907_v13, 0.0 }
 0x14f   : > { %v4478_v15 = vpop.f32.mrf.mxu0 }
 0x150   : > { %v910_v16 = vadd.f32 %v909_v61, %v845_v14  ;;  %v4479_v17 = vadd.f32 %v4478_v15, %v4477_v11  ;;  %v4518_v24 = vpop.f32.mrf.mxu1 }
 0x151   : > { %v4480_v18 = vpop.f32.mrf.mxu0 }
 0x152   : > { %v850_v21 = vadd.f32 %v4479_v17, %v6069_v2  ;;  %v938_v22 = vmax.f32 %v910_v16, 0.0  ;;  %v4520_v28 = vpop.f32.mrf.mxu1 }
 0x153   : > { %v4481_v23 = vpop.f32.mrf.mxu0 }
 0x154   : > { %v4482_v25 = vadd.f32 %v4481_v23, %v4480_v18  ;;  %v945_v26 = vpack.c.bf16 %v938_v22, %v937_v20  ;;  %v915_v29 = vadd.f32 %v4949_v58, %v850_v21  ;;  %v4521_v32 = vpop.f32.mrf.mxu1 }
 0x155   : > { %v4483_v27 = vpop.f32.mrf.mxu0  ;;  %v4522_v3 = vadd.f32 %v4521_v32, %v4520_v28 }
 0x156   : > { %v853_v30 = vadd.f32 %v4482_v25, %v6069_v2  ;;  %5007 = vmatprep.mubr.bf16.mxu0 %v945_v26  ;;  %v4523_v36 = vpop.f32.mrf.mxu1  ;;  %v939_v37 = vmax.f32 %v915_v29, 0.0  ;;  %v5371_v26 = vld [vmem:[%s5950_s20 + $0xc8] ss:$12 sps:$4 sm:$0xff]  }
 0x157   : > { %v4484_v31 = vpop.f32.mrf.mxu0  ;;  %v1092_v18 = vadd.f32 %v4522_v3, %v6069_v2  ;;  %v6138_v3 = vld [vmem:[%s6847_s1 + $0x28] sm:$0xff]  }
 0x158   : > { %v918_v33 = vadd.f32 %v4950_v60, %v853_v30  ;;  %v4485_v34 = vadd.f32 %v4484_v31, %v4483_v27  ;;  %v4524_v41 = vpop.f32.mrf.mxu1  ;;  %v4519_v60 = vadd.f32 %v4518_v24, %v4517_v19 }
 0x159   : > { %v4486_v35 = vpop.f32.mrf.mxu0  ;;  %v4525_v57 = vadd.f32 %v4524_v41, %v4523_v36 }
 0x15a   : > { %v940_v38 = vmax.f32 %v918_v33, 0.0  ;;  %v858_v39 = vadd.f32 %v4485_v34, %v6069_v2  ;;  %v4526_v45 = vpop.f32.mrf.mxu1  ;;  %v1089_v14 = vadd.f32 %v4519_v60, %v6069_v2  ;;  %v6122_v60 = vld [vmem:[%s6847_s1 + $0x30] sm:$0xff]  }
 0x15b   : > { %v4487_v40 = vpop.f32.mrf.mxu0 }
 0x15c   : > { %v946_v42 = vpack.c.bf16 %v940_v38, %v939_v37  ;;  %v4488_v43 = vadd.f32 %v4487_v40, %v4486_v35  ;;  %v923_v46 = vadd.f32 %v922_v1, %v858_v39  ;;  %v4527_v49 = vpop.f32.mrf.mxu1 }
 0x15d   : > { %v4489_v44 = vpop.f32.mrf.mxu0  ;;  %v4528_v61 = vadd.f32 %v4527_v49, %v4526_v45  ;;  %v5379_v49 = vld [vmem:[%s5950_s20 + $0xf8] ss:$12 sps:$4 sm:$0xff]  }
 0x15e   : > { %v861_v47 = vadd.f32 %v4488_v43, %v6069_v2  ;;  %5008 = vmatmul.mubr.bf16.vlgmr.msra.gmra.mxu0 %v946_v42  ;;  %v4529_v53 = vpop.f32.mrf.mxu1  ;;  %v941_v54 = vmax.f32 %v923_v46, 0.0 }
 0x15f   : > { %v4490_v48 = vpop.f32.mrf.mxu0  ;;  %5016 = vmatpush3.bf16.msra.mxu0 %v5928_v4  ;;  %v6086_v4 = vld [vmem:[%s6847_s1 + $0x78] sm:$0xff]   ;;  %v1100_v15 = vadd.f32 %v4528_v61, %v6069_v2  ;;  %v5370_v61 = vld [vmem:[%s5950_s20 + $0xc4] ss:$12 sps:$4 sm:$0xff]  }
 0x160   : > { %v926_v50 = vadd.f32 %v925_v12, %v861_v47  ;;  %v4491_v51 = vadd.f32 %v4490_v48, %v4489_v44  ;;  %5017 = vmatprep.subr.bf16.mxu0 %v5941_v7  ;;  %v4530_v59 = vpop.f32.mrf.mxu1  ;;  %v5372_v47 = vld [vmem:[%s5950_s20 + $0xe0] ss:$12 sps:$4 sm:$0xff]  }
 0x161   : > { %v4492_v52 = vpop.f32.mrf.mxu0  ;;  %v4531_v13 = vadd.f32 %v4530_v59, %v4529_v53 }
 0x162   : > { %v866_v55 = vadd.f32 %v4491_v51, %v6069_v2  ;;  %v942_v56 = vmax.f32 %v926_v50, 0.0  ;;  %v4532_v6 = vpop.f32.mrf.mxu1 }
 0x163   : > { %v4493_v58 = vpop.f32.mrf.mxu0  ;;  %5018 = vmatpush3.bf16.msra.mxu0 %v5941_v7  ;;  %v1097_v7 = vadd.f32 %v4525_v57, %v6069_v2  ;;  %v1105_v29 = vadd.f32 %v4531_v13, %v6069_v2  ;;  %v6202_v13 = vld [vmem:[%s6847_s1 + $0x40] sm:$0xff]  }
 0x164   : > { %v4494_v63 = vadd.f32 %v4493_v58, %v4492_v52  ;;  %v947_v1 = vpack.c.bf16 %v942_v56, %v941_v54  ;;  %4629 = vmatprep.subr.bf16.mxu0 %v6086_v4  ;;  %v931_v0 = vadd.f32 %v6064_v62, %v866_v55  ;;  %v4533_v11 = vpop.f32.mrf.mxu1  ;;  %v6107_v54 = vld [vmem:[%s6847_s1 + $0x38] sm:$0xff]   ;;  %v6113_v55 = vld [vmem:[%s6847_s1 + $0x70] sm:$0xff]  }
 0x165   : > { %v4961_v5 = vpop.f32.mrf.mxu0  ;;  %v4534_v23 = vadd.f32 %v4533_v11, %v4532_v6  ;;  %v6153_v6 = vld [vmem:[%s6847_s1 + $0x20] sm:$0xff]   ;;  %v6188_v11 = vld [vmem:[%s6847_s1 + $0x48] sm:$0xff]  }
 0x166   : > { %v869_v9 = vadd.f32 %v4494_v63, %v6069_v2  ;;  %5011 = vmatprep.mubr.bf16.mxu0 %v947_v1  ;;  %v4535_v17 = vpop.f32.mrf.mxu1  ;;  %v943_v62 = vmax.f32 %v931_v0, 0.0  ;;  %v1162_v22 = vadd.f32 %v4961_v5, %v1097_v7  ;;  %v6130_v63 = vld [vmem:[%s6847_s1 + $0x68] sm:$0xff]   ;;  %v5380_v1 = vld [vmem:[%s5950_s20 + $0x110] ss:$12 sps:$4 sm:$0xff]   ;;  %v6144_v5 = vld [vmem:[%s6847_s1 + $0x60] sm:$0xff]  }
 0x167   : > { %v1153_v10 = vpop.f32.mrf.mxu0  ;;  %v1108_v39 = vadd.f32 %v4534_v23, %v6069_v2  ;;  %v6160_v0 = vld [vmem:[%s6847_s1 + $0x58] sm:$0xff]   ;;  %v6174_v7 = vld [vmem:[%s6847_s1 + $0x50] sm:$0xff]   ;;  %v5386_v23 = vld [vmem:[%s6849_s3 + $0xa8] sm:$0xff]  }
 0x168   : > { %v934_v12 = vadd.f32 %v6071_v8, %v869_v9  ;;  %v1154_v19 = vadd.f32 %v1153_v10, %v1089_v14  ;;  %v4536_v25 = vpop.f32.mrf.mxu1  ;;  %v1186_v36 = vmax.f32 %v1162_v22, 0.0  ;;  %v6167_v9 = vld [vmem:[%s6847_s1 + $0x18] sm:$0xff]   ;;  %v6181_v10 = vld [vmem:[%s6847_s1 + $0x10] sm:$0xff]   ;;  %v5368_v14 = vld [vmem:[%s5950_s20 + $0xc0] ss:$12 sps:$4 sm:$0xff]  }
 0x169   : > { %v4962_v16 = vpop.f32.mrf.mxu0  ;;  %v4537_v8 = vadd.f32 %v4536_v25, %v4535_v17  ;;  %v5375_v17 = vld [vmem:[%s5950_s20 + $0xd8] ss:$12 sps:$4 sm:$0xff]   ;;  %v5385_v22 = vld [vmem:[%s6849_s3 + $0xb0] sm:$0xff]  }
 0x16a   : > { %v1165_v20 = vadd.f32 %v4962_v16, %v1100_v15  ;;  %v944_v21 = vmax.f32 %v934_v12, 0.0  ;;  %v4538_v32 = vpop.f32.mrf.mxu1  ;;  %v1184_v33 = vmax.f32 %v1154_v19, 0.0  ;;  %v6195_v12 = vld [vmem:[%s6847_s1 + $0x8] sm:$0xff]   ;;  %v6210_v15 = vld [vmem:[%s6847_s1] sm:$0xff]   ;;  %v5388_v25 = vld [vmem:[%s6849_s3 + $0x98] sm:$0xff]  }
 0x16b   : > { %v1156_v24 = vpop.f32.mrf.mxu0  ;;  %v1113_v35 = vadd.f32 %v4537_v8, %v6069_v2  ;;  %v5373_v16 = vld [vmem:[%s5950_s20 + $0xdc] ss:$12 sps:$4 sm:$0xff]   ;;  %v5381_v19 = vld [vmem:[%s5950_s20 + $0x10c] ss:$12 sps:$4 sm:$0xff]   ;;  %v5391_v8 = vld [vmem:[%s6849_s3 + $0x80] sm:$0xff]  }
 0x16c   : > { %v1157_v27 = vadd.f32 %v1156_v24, %v1092_v18  ;;  %v948_v28 = vpack.c.bf16 %v944_v21, %v943_v62  ;;  %v1187_v30 = vmax.f32 %v1165_v20, 0.0  ;;  %v4539_v38 = vpop.f32.mrf.mxu1  ;;  %v5376_v18 = vld [vmem:[%s5950_s20 + $0xf4] ss:$12 sps:$4 sm:$0xff]   ;;  %v5378_v62 = vld [vmem:[%s5950_s20 + $0xf0] ss:$12 sps:$4 sm:$0xff]  }
 0x16d   : > { %v4965_v31 = vpop.f32.mrf.mxu0  ;;  %v4540_v43 = vadd.f32 %v4539_v38, %v4538_v32  ;;  %v5383_v20 = vld [vmem:[%s5950_s20 + $0x108] ss:$12 sps:$4 sm:$0xff]   ;;  %v5384_v21 = vld [vmem:[%s6849_s3 + $0xb8] sm:$0xff]   ;;  %v5387_v24 = vld [vmem:[%s6849_s3 + $0xa0] sm:$0xff]  }
 0x16e   : > { %v1185_v34 = vmax.f32 %v1157_v27, 0.0  ;;  %5012 = vmatmul.mubr.bf16.gmra.mxu0 %v948_v28  ;;  %v1178_v41 = vadd.f32 %v4965_v31, %v1113_v35  ;;  %v1193_v44 = vpack.c.bf16 %v1187_v30, %v1186_v36  ;;  %v5390_v27 = vld [vmem:[%s6849_s3 + $0x88] sm:$0xff]   ;;  %v5394_v28 = vld [vmem:[%s5950_s20 + $0x124] ss:$12 sps:$4 sm:$0xff]  }
 0x16f   : > { %v1169_v37 = vpop.f32.mrf.mxu0  ;;  %5019 = vmatprep.mubr.msk.bf16.mxu0 %vm794_vm0, %v5371_v26  ;;  %v1116_v46 = vadd.f32 %v4540_v43, %v6069_v2  ;;  %v5389_v26 = vld [vmem:[%s6849_s3 + $0x90] sm:$0xff]   ;;  %v6250_v30 = vld [vmem:[%s6847_s1 + $0x88] sm:$0xff]   ;;  %v5397_v32 = vld [vmem:[%s5950_s20 + $0x138] ss:$12 sps:$4 sm:$0xff]  }
 0x170   : > { %v1192_v40 = vpack.c.bf16 %v1185_v34, %v1184_v33  ;;  %v1170_v42 = vadd.f32 %v1169_v37, %v1105_v29  ;;  %v1190_v50 = vmax.f32 %v1178_v41, 0.0  ;;  %v5392_v29 = vld [vmem:[%s5950_s20 + $0x120] ss:$12 sps:$4 sm:$0xff]   ;;  %v5395_v31 = vld [vmem:[%s5950_s20 + $0x13c] ss:$12 sps:$4 sm:$0xff]  }
 0x171   : > { %v4966_v45 = vpop.f32.mrf.mxu0  ;;  %v5398_v33 = vld [vmem:[%s5950_s20 + $0x154] ss:$12 sps:$4 sm:$0xff]   ;;  %v5400_v34 = vld [vmem:[%s5950_s20 + $0x150] ss:$12 sps:$4 sm:$0xff]   ;;  %v5401_v35 = vld [vmem:[%s5950_s20 + $0x16c] ss:$12 sps:$4 sm:$0xff]  }
 0x172   : > { %4983 = vmatprep.mubr.bf16.mxu1 %v1192_v40  ;;  %v1188_v51 = vmax.f32 %v1170_v42, 0.0  ;;  %v1181_v52 = vadd.f32 %v4966_v45, %v1116_v46  ;;  %v5404_v36 = vld [vmem:[%s5950_s20 + $0x168] ss:$12 sps:$4 sm:$0xff]  }
 0x173   : > { %v1172_v48 = vpop.f32.mrf.mxu0  ;;  %4984 = vmatmul.mubr.bf16.vlgmr.msra.gmra.mxu1 %v1193_v44 }
 0x174   : > { %v1173_v53 = vadd.f32 %v1172_v48, %v1108_v39  ;;  %4572 = vmatpush3.bf16.msra.mxu1 %v6107_v54  ;;  %v1191_v56 = vmax.f32 %v1181_v52, 0.0 }
 0x175   : > { %4573 = vmatprep.subr.bf16.mxu1 %v6113_v55 }
 0x176   : > { %v1189_v57 = vmax.f32 %v1173_v53, 0.0  ;;  %5020 = vmatmul.mubr.msk.bf16.vlgmr.msra.gmra.mxu0 %vm794_vm0, %v5372_v47  ;;  %v1195_v58 = vpack.c.bf16 %v1191_v56, %v1190_v50 }
 0x177   : > { %5023 = vmatprep.mubr.msk.bf16.mxu0 %vm794_vm0, %v5379_v49  ;;  %4630 = vmatpush3.bf16.msra.mxu0 %v6107_v54 }
 0x178   : > { %v1194_v59 = vpack.c.bf16 %v1189_v57, %v1188_v51  ;;  %4574 = vmatpush3.bf16.msra.mxu1 %v6122_v60  ;;  %4631 = vmatprep.subr.bf16.mxu0 %v6113_v55 }
 0x179   : > { %4575 = vmatprep.subr.bf16.mxu1 %v6130_v63 }
 0x17a   : > { %4987 = vmatprep.mubr.bf16.mxu1 %v1194_v59 }
 0x17b   : > { %4988 = vmatmul.mubr.bf16.gmra.mxu1 %v1195_v58  ;;  %4632 = vmatpush3.bf16.msra.mxu0 %v6122_v60 }
 0x17c   : > { %4576 = vmatpush3.bf16.msra.mxu1 %v6138_v3  ;;  %1560 = vmatprep.mubr.bf16.mxu1 %v5370_v61 }
 0x17d   : > { %4577 = vmatprep.subr.bf16.mxu1 %v6144_v5  ;;  %4633 = vmatprep.subr.bf16.mxu0 %v6130_v63 }
 0x17e   : > { %5024 = vmatmul.mubr.msk.bf16.gmra.mxu0 %vm794_vm0, %v5380_v1 }
 0x17f   : > { %4634 = vmatpush3.bf16.msra.mxu0 %v6138_v3  ;;  %1929 = vmatprep.mubr.bf16.mxu0 %v5394_v28 }
 0x180   : > { %4578 = vmatpush3.bf16.msra.mxu1 %v6153_v6  ;;  %4635 = vmatprep.subr.bf16.mxu0 %v6144_v5 }
 0x181   : > { %4579 = vmatprep.subr.bf16.mxu1 %v6160_v0 }
 0x183   : > { %4636 = vmatpush3.bf16.msra.mxu0 %v6153_v6 }
 0x184   : > { %4580 = vmatpush3.bf16.msra.mxu1 %v6167_v9  ;;  %4637 = vmatprep.subr.bf16.mxu0 %v6160_v0 }
 0x185   : > { %4581 = vmatprep.subr.bf16.mxu1 %v6174_v7 }
 0x187   : > { %4638 = vmatpush3.bf16.msra.mxu0 %v6167_v9 }
 0x188   : > { %4582 = vmatpush3.bf16.msra.mxu1 %v6181_v10  ;;  %4639 = vmatprep.subr.bf16.mxu0 %v6174_v7 }
 0x189   : > { %4583 = vmatprep.subr.bf16.mxu1 %v6188_v11 }
 0x18b   : > { %4640 = vmatpush3.bf16.msra.mxu0 %v6181_v10 }
 0x18c   : > { %4584 = vmatpush3.bf16.msra.mxu1 %v6195_v12  ;;  %4641 = vmatprep.subr.bf16.mxu0 %v6188_v11 }
 0x18d   : > { %4585 = vmatprep.subr.bf16.mxu1 %v6202_v13 }
 0x18f   : > { %4642 = vmatpush3.bf16.msra.mxu0 %v6195_v12 }
 0x190   : > { %4586 = vmatpush3.bf16.msra.mxu1 %v6210_v15  ;;  %4643 = vmatprep.subr.bf16.mxu0 %v6202_v13 }
 0x191   : > { %5027 = vmatprep.subr.bf16.mxu1 %v5384_v21 }
 0x193   : > { %1561 = vmatmul.mubr.bf16.vlgmr.msra.gmra.mxu1 %v5368_v14  ;;  %4644 = vmatpush3.bf16.msra.mxu0 %v6210_v15 }
 0x194   : > { %1568 = vmatprep.mubr.bf16.mxu1 %v5373_v16  ;;  %5028 = vmatpush3.bf16.msra.mxu1 %v5384_v21 }
 0x195   : > { %5029 = vmatprep.subr.bf16.mxu1 %v5385_v22 }
 0x196   : > { %1930 = vmatmul.mubr.bf16.vlgmr.msra.gmra.mxu0 %v5392_v29 }
 0x197   : > { %1937 = vmatprep.mubr.bf16.mxu0 %v5395_v31 }
 0x198   : > { %5030 = vmatpush3.bf16.msra.mxu1 %v5385_v22 }
 0x199   : > { %5031 = vmatprep.subr.bf16.mxu1 %v5386_v23 }
 0x19b   : > { %1569 = vmatmul.mubr.bf16.gmra.mxu1 %v5375_v17 }
 0x19c   : > { %1576 = vmatprep.mubr.bf16.mxu1 %v5376_v18  ;;  %5032 = vmatpush3.bf16.msra.mxu1 %v5386_v23 }
 0x19d   : > { %5033 = vmatprep.subr.bf16.mxu1 %v5387_v24 }
 0x19e   : > { %1938 = vmatmul.mubr.bf16.gmra.mxu0 %v5397_v32 }
 0x19f   : > { %1945 = vmatprep.mubr.bf16.mxu0 %v5398_v33 }
 0x1a0   : > { %5034 = vmatpush3.bf16.msra.mxu1 %v5387_v24 }
 0x1a1   : > { %5035 = vmatprep.subr.bf16.mxu1 %v5388_v25 }
 0x1a3   : > { %1577 = vmatmul.mubr.bf16.gmra.mxu1 %v5378_v62 }
 0x1a4   : > { %1584 = vmatprep.mubr.bf16.mxu1 %v5381_v19  ;;  %5036 = vmatpush3.bf16.msra.mxu1 %v5388_v25 }
 0x1a5   : > { %5037 = vmatprep.subr.bf16.mxu1 %v5389_v26 }
 0x1a6   : > { %1946 = vmatmul.mubr.bf16.gmra.mxu0 %v5400_v34 }
 0x1a7   : > { %1953 = vmatprep.mubr.bf16.mxu0 %v5401_v35 }
 0x1a8   : > { %5038 = vmatpush3.bf16.msra.mxu1 %v5389_v26 }
 0x1a9   : > { %5039 = vmatprep.subr.bf16.mxu1 %v5390_v27 }
 0x1ab   : > { %1585 = vmatmul.mubr.bf16.gmra.mxu1 %v5383_v20 }
 0x1ac   : > { %5040 = vmatpush3.bf16.msra.mxu1 %v5390_v27 }
 0x1ad   : > { %5041 = vmatprep.subr.bf16.mxu1 %v5391_v8 }
 0x1ae   : > { %1954 = vmatmul.mubr.bf16.gmra.mxu0 %v5404_v36 }
 0x1b0   : > { %5042 = vmatpush3.bf16.msra.mxu1 %v5391_v8 }
 0x1b1   : > { %5051 = vmatprep.subr.bf16.mxu1 %v6250_v30 }
 0x21e   : > { %v5009_v37 = vpop.f32.mrf.mxu0 }
 0x220   : > { %v1408_v38 = vpop.f32.mrf.mxu0 }
 0x222   : > { %v5010_v39 = vpop.f32.mrf.mxu0 }
 0x224   : > { %v1411_v40 = vpop.f32.mrf.mxu0 }
 0x22e   : > { %v5013_v43 = vpop.f32.mrf.mxu0 }
 0x230   : > { %v1424_v48 = vpop.f32.mrf.mxu0 }
 0x232   : > { %v5014_v53 = vpop.f32.mrf.mxu0 }
 0x233   : > { %v4985_v41 = vpop.f32.mrf.mxu1 }
 0x234   : > { %v6259_v42 = vadd.f32 %v5009_v37, %v4985_v41  ;;  %v1427_v61 = vpop.f32.mrf.mxu0 }
 0x235   : > { %v1295_v44 = vpop.f32.mrf.mxu1 }
 0x236   : > { %v6261_v45 = vadd.f32 %v1408_v38, %v1295_v44  ;;  %v5021_v16 = vpop.f32.mrf.mxu0 }
 0x237   : > { %v4986_v46 = vpop.f32.mrf.mxu1 }
 0x238   : > { %v6263_v47 = vadd.f32 %v5010_v39, %v4986_v46  ;;  %v1627_v18 = vpop.f32.mrf.mxu0 }
 0x239   : > { %v1298_v49 = vpop.f32.mrf.mxu1 }
 0x23a   : > { %v6265_v50 = vadd.f32 %v1411_v40, %v1298_v49  ;;  %v5022_v21 = vpop.f32.mrf.mxu0 }
 0x23b   : > { %v4989_v51 = vpop.f32.mrf.mxu1 }
 0x23c   : > { %v6267_v52 = vadd.f32 %v5013_v43, %v4989_v51  ;;  %v1630_v26 = vpop.f32.mrf.mxu0 }
 0x23d   : > { %v1311_v56 = vpop.f32.mrf.mxu1 }
 0x23e   : > { %v6269_v57 = vadd.f32 %v1424_v48, %v1311_v56  ;;  %v5025_v33 = vpop.f32.mrf.mxu0 }
 0x23f   : > { %v4990_v58 = vpop.f32.mrf.mxu1 }
 0x240   : > { %v6271_v59 = vadd.f32 %v5014_v53, %v4990_v58  ;;  %v1643_v41 = vpop.f32.mrf.mxu0 }
 0x241   : > { %v1314_v1 = vpop.f32.mrf.mxu1 }
 0x242   : > { %v6273_v14 = vadd.f32 %v1427_v61, %v1314_v1  ;;  %v5026_v53 = vpop.f32.mrf.mxu0 }
 0x253   : > { %v4587_v17 = vpop.f32.mrf.mxu1 }
 0x255   : > { %v4588_v62 = vpop.f32.mrf.mxu1 }
 0x256   : > { %v4589_v19 = vadd.f32 %v4588_v62, %v4587_v17 }
 0x257   : > { %v4590_v20 = vpop.f32.mrf.mxu1 }
 0x258   : > { %v1563_v22 = vadd.f32 %v4589_v19, %v6069_v2  ;;  %v1646_v19 = vpop.f32.mrf.mxu0 }
 0x259   : > { %v4591_v23 = vpop.f32.mrf.mxu1 }
 0x25a   : > { %v4592_v24 = vadd.f32 %v4591_v23, %v4590_v20  ;;  %v1628_v27 = vadd.f32 %v1627_v18, %v1563_v22 }
 0x25b   : > { %v4593_v25 = vpop.f32.mrf.mxu1 }
 0x25c   : > { %v1566_v8 = vadd.f32 %v4592_v24, %v6069_v2  ;;  %v1658_v34 = vmax.f32 %v1628_v27, 0.0  ;;  %v6285_v24 = vld [vmem:[%s6847_s1 + $0x80] sm:$0xff]  }
 0x25d   : > { %v4594_v28 = vpop.f32.mrf.mxu1 }
 0x25e   : > { %v4595_v29 = vadd.f32 %v4594_v28, %v4593_v25  ;;  %v1631_v31 = vadd.f32 %v1630_v26, %v1566_v8 }
 0x25f   : > { %v4596_v32 = vpop.f32.mrf.mxu1 }
 0x260   : > { %v1571_v35 = vadd.f32 %v4595_v29, %v6069_v2  ;;  %v1659_v36 = vmax.f32 %v1631_v31, 0.0 }
 0x261   : > { %v4597_v37 = vpop.f32.mrf.mxu1 }
 0x262   : > { %v1666_v38 = vpack.c.bf16 %v1659_v36, %v1658_v34  ;;  %v4598_v39 = vadd.f32 %v4597_v37, %v4596_v32  ;;  %v1636_v43 = vadd.f32 %v5021_v16, %v1571_v35 }
 0x263   : > { %v4599_v40 = vpop.f32.mrf.mxu1 }
 0x264   : > { %v1574_v44 = vadd.f32 %v4598_v39, %v6069_v2  ;;  %5043 = vmatprep.mubr.bf16.mxu1 %v1666_v38  ;;  %v1660_v56 = vmax.f32 %v1636_v43, 0.0  ;;  %v5403_v38 = vld [vmem:[%s5950_s20 + $0x128] ss:$12 sps:$4 sm:$0xff]   ;;  %v5408_v43 = vld [vmem:[%s6849_s3 + $0xf8] sm:$0xff]  }
 0x265   : > { %v4600_v46 = vpop.f32.mrf.mxu1  ;;  %5063 = vmatprep.subr.bf16.mxu0 %v5408_v43 }
 0x266   : > { %v1639_v48 = vadd.f32 %v5022_v21, %v1574_v44  ;;  %v4601_v49 = vadd.f32 %v4600_v46, %v4599_v40  ;;  %v5405_v40 = vld [vmem:[%s5950_s20 + $0x140] ss:$12 sps:$4 sm:$0xff]   ;;  %5064 = vmatpush3.bf16.msra.mxu0 %v5408_v43  ;;  %v5409_v44 = vld [vmem:[%s6849_s3 + $0xf0] sm:$0xff]  }
 0x267   : > { %v4602_v51 = vpop.f32.mrf.mxu1  ;;  %v5410_v46 = vld [vmem:[%s6849_s3 + $0xe8] sm:$0xff]   ;;  %5065 = vmatprep.subr.bf16.mxu0 %v5409_v44 }
 0x268   : > { %v1661_v58 = vmax.f32 %v1639_v48, 0.0  ;;  %v1579_v61 = vadd.f32 %v4601_v49, %v6069_v2  ;;  %v5411_v48 = vld [vmem:[%s6849_s3 + $0xe0] sm:$0xff]   ;;  %v5412_v49 = vld [vmem:[%s6849_s3 + $0xd8] sm:$0xff]  }
 0x269   : > { %v4603_v1 = vpop.f32.mrf.mxu1 }
 0x26a   : > { %v1667_v17 = vpack.c.bf16 %v1661_v58, %v1660_v56  ;;  %v4604_v18 = vadd.f32 %v4603_v1, %v4602_v51  ;;  %v1644_v20 = vadd.f32 %v1643_v41, %v1579_v61  ;;  %v5406_v41 = vld [vmem:[%s5950_s20 + $0x158] ss:$12 sps:$4 sm:$0xff]   ;;  %5066 = vmatpush3.bf16.msra.mxu0 %v5409_v44  ;;  %v5413_v51 = vld [vmem:[%s6849_s3 + $0xd0] sm:$0xff]   ;;  %v5414_v56 = vld [vmem:[%s5950_s20 + $0x180] ss:$12 sps:$4 sm:$0xff]  }
 0x26b   : > { %v4605_v62 = vpop.f32.mrf.mxu1  ;;  %5067 = vmatprep.subr.bf16.mxu0 %v5410_v46  ;;  %v5417_v58 = vld [vmem:[%s6849_s3 + $0xc8] sm:$0xff]   ;;  %v5418_v61 = vld [vmem:[%s6849_s3 + $0xc0] sm:$0xff]  }
 0x26c   : > { %5044 = vmatmul.mubr.bf16.vlgmr.msra.gmra.mxu1 %v1667_v17  ;;  %v1582_v16 = vadd.f32 %v4604_v18, %v6069_v2  ;;  %v1662_v26 = vmax.f32 %v1644_v20, 0.0  ;;  %v5419_v1 = vld [vmem:[%s5950_s20 + $0x19c] ss:$12 sps:$4 sm:$0xff]   ;;  %v5421_v17 = vld [vmem:[%s5950_s20 + $0x198] ss:$12 sps:$4 sm:$0xff]  }
 0x26d   : > { %v4606_v22 = vpop.f32.mrf.mxu1  ;;  %5052 = vmatpush3.bf16.msra.mxu1 %v6250_v30  ;;  %v5422_v18 = vld [vmem:[%s5950_s20 + $0x1b4] ss:$12 sps:$4 sm:$0xff]  }
 0x26e   : > { %v4607_v21 = vadd.f32 %v4606_v22, %v4605_v62  ;;  %v1647_v23 = vadd.f32 %v1646_v19, %v1582_v16  ;;  %5053 = vmatprep.subr.bf16.mxu1 %v6285_v24  ;;  %5068 = vmatpush3.bf16.msra.mxu0 %v5410_v46  ;;  %v5424_v62 = vld [vmem:[%s5950_s20 + $0x1b0] ss:$12 sps:$4 sm:$0xff]   ;;  %v5425_v19 = vld [vmem:[%s5950_s20 + $0x1cc] ss:$12 sps:$4 sm:$0xff]   ;;  %v5428_v20 = vld [vmem:[%s5950_s20 + $0x1c8] ss:$12 sps:$4 sm:$0xff]   ;;  %v4645_v16 = vpop.f32.mrf.mxu0 }
 0x26f   : > { %v4608_v25 = vpop.f32.mrf.mxu1  ;;  %5069 = vmatprep.subr.bf16.mxu0 %v5411_v48 }
 0x270   : > { %v1587_v27 = vadd.f32 %v4607_v21, %v6069_v2  ;;  %v1663_v8 = vmax.f32 %v1647_v23, 0.0  ;;  %v4646_v22 = vpop.f32.mrf.mxu0  ;;  %v5432_v21 = vld [vmem:[%s6849_s3 + $0x138] sm:$0xff]  }
 0x271   : > { %v4609_v28 = vpop.f32.mrf.mxu1  ;;  %5054 = vmatpush3.bf16.msra.mxu1 %v6285_v24 }
 0x272   : > { %v1668_v29 = vpack.c.bf16 %v1663_v8, %v1662_v26  ;;  %v4610_v31 = vadd.f32 %v4609_v28, %v4608_v25  ;;  %4687 = vmatprep.subr.bf16.mxu1 %v6086_v4  ;;  %v1652_v32 = vadd.f32 %v5025_v33, %v1587_v27  ;;  %v5407_v33 = vld [vmem:[%s5950_s20 + $0x170] ss:$12 sps:$4 sm:$0xff]   ;;  %5070 = vmatpush3.bf16.msra.mxu0 %v5411_v48  ;;  %v4648_v23 = vpop.f32.mrf.mxu0 }
 0x273   : > { %5071 = vmatprep.subr.bf16.mxu0 %v5412_v49 }
 0x274   : > { %v1590_v34 = vadd.f32 %v4610_v31, %v6069_v2  ;;  %5047 = vmatprep.mubr.bf16.mxu1 %v1668_v29  ;;  %v1664_v36 = vmax.f32 %v1652_v32, 0.0  ;;  %v4649_v25 = vpop.f32.mrf.mxu0 }
 0x276   : > { %v1655_v35 = vadd.f32 %v5026_v53, %v1590_v34  ;;  %5072 = vmatpush3.bf16.msra.mxu0 %v5412_v49  ;;  %v5416_v53 = vld [vmem:[%s5950_s20 + $0x184] ss:$12 sps:$4 sm:$0xff]   ;;  %v4651_v26 = vpop.f32.mrf.mxu0 }
 0x277   : > { %5073 = vmatprep.subr.bf16.mxu0 %v5413_v51 }
 0x278   : > { %v1665_v37 = vmax.f32 %v1655_v35, 0.0  ;;  %v4652_v27 = vpop.f32.mrf.mxu0 }
 0x27a   : > { %v1669_v39 = vpack.c.bf16 %v1665_v37, %v1664_v36  ;;  %5074 = vmatpush3.bf16.msra.mxu0 %v5413_v51  ;;  %v4654_v8 = vpop.f32.mrf.mxu0 }
 0x27b   : > { %5075 = vmatprep.subr.bf16.mxu0 %v5417_v58 }
 0x27c   : > { %5048 = vmatmul.mubr.bf16.gmra.mxu1 %v1669_v39  ;;  %v4655_v28 = vpop.f32.mrf.mxu0 }
 0x27d   : > { %5055 = vmatprep.mubr.msk.bf16.mxu1 %vm794_vm0, %v5403_v38 }
 0x27e   : > { %5076 = vmatpush3.bf16.msra.mxu0 %v5417_v58  ;;  %v4657_v31 = vpop.f32.mrf.mxu0  ;;  %v4653_v58 = vadd.f32 %v4652_v27, %v4651_v26 }
 0x27f   : > { %5077 = vmatprep.subr.bf16.mxu0 %v5418_v61 }
 0x280   : > { %v4658_v37 = vpop.f32.mrf.mxu0 }
 0x281   : > { %v4659_v26 = vadd.f32 %v4658_v37, %v4657_v31 }
 0x282   : > { %5078 = vmatpush3.bf16.msra.mxu0 %v5418_v61 }
 0x283   : > { %5087 = vmatprep.subr.bf16.mxu0 %v6250_v30 }
 0x284   : > { %5056 = vmatmul.mubr.msk.bf16.vlgmr.msra.gmra.mxu1 %vm794_vm0, %v5405_v40 }
 0x285   : > { %5059 = vmatprep.mubr.msk.bf16.mxu1 %vm794_vm0, %v5406_v41  ;;  %4688 = vmatpush3.bf16.msra.mxu1 %v6107_v54  ;;  %v4660_v41 = vpop.f32.mrf.mxu0 }
 0x286   : > { %4689 = vmatprep.subr.bf16.mxu1 %v6113_v55 }
 0x289   : > { %4690 = vmatpush3.bf16.msra.mxu1 %v6122_v60 }
 0x28a   : > { %4691 = vmatprep.subr.bf16.mxu1 %v6130_v63 }
 0x28c   : > { %5060 = vmatmul.mubr.msk.bf16.gmra.mxu1 %vm794_vm0, %v5407_v33  ;;  %v4661_v33 = vpop.f32.mrf.mxu0 }
 0x28d   : > { %4692 = vmatpush3.bf16.msra.mxu1 %v6138_v3  ;;  %2298 = vmatprep.mubr.bf16.mxu1 %v5416_v53  ;;  %v4647_v53 = vadd.f32 %v4646_v22, %v4645_v16 }
 0x28e   : > { %4693 = vmatprep.subr.bf16.mxu1 %v6144_v5  ;;  %v4663_v44 = vpop.f32.mrf.mxu0 }
 0x290   : > { %v4664_v49 = vpop.f32.mrf.mxu0 }
 0x291   : > { %4694 = vmatpush3.bf16.msra.mxu1 %v6153_v6 }
 0x292   : > { %4695 = vmatprep.subr.bf16.mxu1 %v6160_v0 }
 0x295   : > { %4696 = vmatpush3.bf16.msra.mxu1 %v6167_v9 }
 0x296   : > { %4697 = vmatprep.subr.bf16.mxu1 %v6174_v7 }
 0x299   : > { %4698 = vmatpush3.bf16.msra.mxu1 %v6181_v10 }
 0x29a   : > { %4699 = vmatprep.subr.bf16.mxu1 %v6188_v11 }
 0x29d   : > { %4700 = vmatpush3.bf16.msra.mxu1 %v6195_v12 }
 0x29e   : > { %4701 = vmatprep.subr.bf16.mxu1 %v6202_v13 }
 0x2a1   : > { %4702 = vmatpush3.bf16.msra.mxu1 %v6210_v15 }
 0x2a2   : > { %5099 = vmatprep.subr.bf16.mxu1 %v5432_v21 }
 0x2a4   : > { %2299 = vmatmul.mubr.bf16.vlgmr.msra.gmra.mxu1 %v5414_v56 }
 0x2a5   : > { %2306 = vmatprep.mubr.bf16.mxu1 %v5419_v1  ;;  %5100 = vmatpush3.bf16.msra.mxu1 %v5432_v21  ;;  %v4666_v1 = vpop.f32.mrf.mxu0 }
 0x2ac   : > { %2307 = vmatmul.mubr.bf16.gmra.mxu1 %v5421_v17 }
 0x2ad   : > { %2314 = vmatprep.mubr.bf16.mxu1 %v5422_v18  ;;  %v1932_v18 = vadd.f32 %v4647_v53, %v6069_v2 }
 0x2b4   : > { %2315 = vmatmul.mubr.bf16.gmra.mxu1 %v5424_v62  ;;  %v1940_v62 = vadd.f32 %v4653_v58, %v6069_v2 }
 0x2b5   : > { %2322 = vmatprep.mubr.bf16.mxu1 %v5425_v19 }
 0x2bc   : > { %2323 = vmatmul.mubr.bf16.gmra.mxu1 %v5428_v20 }
 0x32c   : > { %v5045_v29 = vpop.f32.mrf.mxu1 }
 0x32d   : > { %v6352_v32 = vadd.f32 %v5045_v29, %v6259_v42  ;;  %v4662_v29 = vadd.f32 %v4661_v33, %v4660_v41 }
 0x32e   : > { %v1769_v34 = vpop.f32.mrf.mxu1 }
 0x32f   : > { %v6355_v35 = vadd.f32 %v1769_v34, %v6261_v45  ;;  %v1951_v37 = vadd.f32 %v4662_v29, %v6069_v2  ;;  %v5448_v29 = vld [vmem:[%s5950_s20 + $0x210] ss:$12 sps:$4 sm:$0xff]  }
 0x330   : > { %v5046_v36 = vpop.f32.mrf.mxu1 }
 0x331   : > { %v6358_v38 = vadd.f32 %v5046_v36, %v6263_v47 }
 0x332   : > { %v1772_v39 = vpop.f32.mrf.mxu1 }
 0x333   : > { %v6361_v40 = vadd.f32 %v1772_v39, %v6265_v50  ;;  %v4656_v50 = vadd.f32 %v4655_v28, %v4654_v8 }
 0x33c   : > { %v5049_v43 = vpop.f32.mrf.mxu1 }
 0x33d   : > { %v6364_v42 = vadd.f32 %v5049_v43, %v6267_v52  ;;  %v4650_v52 = vadd.f32 %v4649_v25, %v4648_v23 }
 0x33e   : > { %v1785_v46 = vpop.f32.mrf.mxu1 }
 0x33f   : > { %v6367_v45 = vadd.f32 %v1785_v46, %v6269_v57  ;;  %v1943_v57 = vadd.f32 %v4656_v50, %v6069_v2  ;;  %v1935_v16 = vadd.f32 %v4650_v52, %v6069_v2 }
 0x340   : > { %v5050_v48 = vpop.f32.mrf.mxu1 }
 0x341   : > { %v6370_v47 = vadd.f32 %v5050_v48, %v6271_v59  ;;  %v4667_v59 = vpop.f32.mrf.mxu0 }
 0x342   : > { %v1788_v51 = vpop.f32.mrf.mxu1  ;;  %v4668_v27 = vadd.f32 %v4667_v59, %v4666_v1  ;;  %v5431_v59 = vld [vmem:[%s5950_s20 + $0x1d0] ss:$12 sps:$4 sm:$0xff]  }
 0x343   : > { %v6373_v56 = vadd.f32 %v1788_v51, %v6273_v14  ;;  %v4665_v14 = vadd.f32 %v4664_v49, %v4663_v44  ;;  %v1948_v51 = vadd.f32 %v4659_v26, %v6069_v2  ;;  %v5441_v26 = vld [vmem:[%s6849_s3 + $0x108] sm:$0xff]  }
 0x344   : > { %v5057_v61 = vpop.f32.mrf.mxu1  ;;  %v1959_v53 = vadd.f32 %v4668_v27, %v6069_v2  ;;  %v5442_v27 = vld [vmem:[%s6849_s3 + $0x100] sm:$0xff]  }
 0x345   : > { %v2005_v22 = vadd.f32 %v5057_v61, %v1940_v62  ;;  %v1956_v43 = vadd.f32 %v4665_v14, %v6069_v2  ;;  %v5429_v62 = vld [vmem:[%s5950_s20 + $0x1a0] ss:$12 sps:$4 sm:$0xff]   ;;  %v5440_v14 = vld [vmem:[%s5950_s20 + $0x1e4] ss:$12 sps:$4 sm:$0xff]  }
 0x346   : > { %v1996_v17 = vpop.f32.mrf.mxu1 }
 0x347   : > { %v1997_v20 = vadd.f32 %v1996_v17, %v1932_v18  ;;  %v2029_v39 = vmax.f32 %v2005_v22, 0.0  ;;  %v5437_v22 = vld [vmem:[%s6849_s3 + $0x110] sm:$0xff]  }
 0x348   : > { %v5058_v19 = vpop.f32.mrf.mxu1 }
 0x349   : > { %v2008_v21 = vadd.f32 %v5058_v19, %v1943_v57  ;;  %v2027_v34 = vmax.f32 %v1997_v20, 0.0  ;;  %v5427_v57 = vld [vmem:[%s5950_s20 + $0x188] ss:$12 sps:$4 sm:$0xff]   ;;  %v5430_v19 = vld [vmem:[%s5950_s20 + $0x1b8] ss:$12 sps:$4 sm:$0xff]  }
 0x34a   : > { %v1999_v8 = vpop.f32.mrf.mxu1  ;;  %v5434_v20 = vld [vmem:[%s6849_s3 + $0x128] sm:$0xff]  }
 0x34b   : > { %v2000_v28 = vadd.f32 %v1999_v8, %v1935_v16  ;;  %v2030_v23 = vmax.f32 %v2008_v21, 0.0  ;;  %v5435_v21 = vld [vmem:[%s6849_s3 + $0x120] sm:$0xff]   ;;  %v5436_v16 = vld [vmem:[%s6849_s3 + $0x118] sm:$0xff]  }
 0x34c   : > { %v5061_v25 = vpop.f32.mrf.mxu1  ;;  %v5438_v8 = vld [vmem:[%s5950_s20 + $0x1e0] ss:$12 sps:$4 sm:$0xff]  }
 0x34d   : > { %v2028_v36 = vmax.f32 %v2000_v28, 0.0  ;;  %v2036_v50 = vpack.c.bf16 %v2030_v23, %v2029_v39  ;;  %v2021_v41 = vadd.f32 %v5061_v25, %v1956_v43  ;;  %v5443_v28 = vld [vmem:[%s5950_s20 + $0x1fc] ss:$12 sps:$4 sm:$0xff]   ;;  %v5445_v23 = vld [vmem:[%s5950_s20 + $0x1f8] ss:$12 sps:$4 sm:$0xff]  }
 0x34e   : > { %v2012_v46 = vpop.f32.mrf.mxu1  ;;  %v5446_v25 = vld [vmem:[%s5950_s20 + $0x214] ss:$12 sps:$4 sm:$0xff]  }
 0x34f   : > { %v2035_v48 = vpack.c.bf16 %v2028_v36, %v2027_v34  ;;  %v2013_v49 = vadd.f32 %v2012_v46, %v1948_v51  ;;  %v2033_v17 = vmax.f32 %v2021_v41, 0.0  ;;  %v5449_v34 = vld [vmem:[%s5950_s20 + $0x22c] ss:$12 sps:$4 sm:$0xff]   ;;  %v5452_v36 = vld [vmem:[%s5950_s20 + $0x228] ss:$12 sps:$4 sm:$0xff]  }
 0x350   : > { %v5062_v44 = vpop.f32.mrf.mxu1  ;;  %v5456_v46 = vld [vmem:[%s6849_s3 + $0x178] sm:$0xff]  }
 0x351   : > { %v2024_v31 = vadd.f32 %v5062_v44, %v1959_v53  ;;  %5079 = vmatprep.mubr.bf16.mxu0 %v2035_v48  ;;  %v2031_v1 = vmax.f32 %v2013_v49, 0.0 }
 0x352   : > { %v2015_v33 = vpop.f32.mrf.mxu1  ;;  %5080 = vmatmul.mubr.bf16.vlgmr.msra.gmra.mxu0 %v2036_v50 }
 0x353   : > { %v2016_v58 = vadd.f32 %v2015_v33, %v1951_v37  ;;  %5088 = vmatpush3.bf16.msra.mxu0 %v6250_v30  ;;  %v2034_v61 = vmax.f32 %v2024_v31, 0.0 }
 0x354   : > { %5089 = vmatprep.subr.bf16.mxu0 %v6285_v24 }
 0x355   : > { %v2032_v52 = vmax.f32 %v2016_v58, 0.0  ;;  %v2038_v2 = vpack.c.bf16 %v2034_v61, %v2033_v17 }
 0x357   : > { %v2037_v18 = vpack.c.bf16 %v2032_v52, %v2031_v1  ;;  %5090 = vmatpush3.bf16.msra.mxu0 %v6285_v24 }
 0x358   : > { %4745 = vmatprep.subr.bf16.mxu0 %v6086_v4  ;;  %v5433_v4 = vld [vmem:[%s6849_s3 + $0x130] sm:$0xff]  }
 0x359   : > { %5083 = vmatprep.mubr.bf16.mxu0 %v2037_v18  ;;  %5101 = vmatprep.subr.bf16.mxu1 %v5433_v4 }
 0x35a   : > { %5084 = vmatmul.mubr.bf16.gmra.mxu0 %v2038_v2  ;;  %5102 = vmatpush3.bf16.msra.mxu1 %v5433_v4 }
 0x35b   : > { %5091 = vmatprep.mubr.msk.bf16.mxu0 %vm794_vm0, %v5427_v57  ;;  %5103 = vmatprep.subr.bf16.mxu1 %v5434_v20 }
 0x35e   : > { %5104 = vmatpush3.bf16.msra.mxu1 %v5434_v20 }
 0x35f   : > { %5105 = vmatprep.subr.bf16.mxu1 %v5435_v21 }
 0x362   : > { %5092 = vmatmul.mubr.msk.bf16.vlgmr.msra.gmra.mxu0 %vm794_vm0, %v5429_v62  ;;  %5106 = vmatpush3.bf16.msra.mxu1 %v5435_v21 }
 0x363   : > { %5095 = vmatprep.mubr.msk.bf16.mxu0 %vm794_vm0, %v5430_v19  ;;  %4746 = vmatpush3.bf16.msra.mxu0 %v6107_v54 }
 0x364   : > { %4747 = vmatprep.subr.bf16.mxu0 %v6113_v55  ;;  %5107 = vmatprep.subr.bf16.mxu1 %v5436_v16  ;;  %v4703_v39 = vpop.f32.mrf.mxu1 }
 0x366   : > { %5108 = vmatpush3.bf16.msra.mxu1 %v5436_v16  ;;  %v4704_v43 = vpop.f32.mrf.mxu1 }
 0x367   : > { %4748 = vmatpush3.bf16.msra.mxu0 %v6122_v60  ;;  %5109 = vmatprep.subr.bf16.mxu1 %v5437_v22  ;;  %v4705_v16 = vadd.f32 %v4704_v43, %v4703_v39 }
 0x368   : > { %4749 = vmatprep.subr.bf16.mxu0 %v6130_v63  ;;  %v4706_v48 = vpop.f32.mrf.mxu1 }
 0x36a   : > { %5096 = vmatmul.mubr.msk.bf16.gmra.mxu0 %vm794_vm0, %v5431_v59  ;;  %5110 = vmatpush3.bf16.msra.mxu1 %v5437_v22  ;;  %v4707_v51 = vpop.f32.mrf.mxu1 }
 0x36b   : > { %4750 = vmatpush3.bf16.msra.mxu0 %v6138_v3  ;;  %2667 = vmatprep.mubr.bf16.mxu0 %v5440_v14 }
 0x36c   : > { %4751 = vmatprep.subr.bf16.mxu0 %v6144_v5  ;;  %5111 = vmatprep.subr.bf16.mxu1 %v5441_v26  ;;  %v4709_v53 = vpop.f32.mrf.mxu1 }
 0x36e   : > { %5112 = vmatpush3.bf16.msra.mxu1 %v5441_v26  ;;  %v4710_v50 = vpop.f32.mrf.mxu1 }
 0x36f   : > { %4752 = vmatpush3.bf16.msra.mxu0 %v6153_v6  ;;  %5113 = vmatprep.subr.bf16.mxu1 %v5442_v27  ;;  %v4711_v14 = vadd.f32 %v4710_v50, %v4709_v53 }
 0x370   : > { %4753 = vmatprep.subr.bf16.mxu0 %v6160_v0  ;;  %v4712_v44 = vpop.f32.mrf.mxu1 }
 0x372   : > { %5114 = vmatpush3.bf16.msra.mxu1 %v5442_v27  ;;  %v4713_v49 = vpop.f32.mrf.mxu1 }
 0x373   : > { %4754 = vmatpush3.bf16.msra.mxu0 %v6167_v9  ;;  %5123 = vmatprep.subr.bf16.mxu1 %v6250_v30  ;;  %v4714_v22 = vadd.f32 %v4713_v49, %v4712_v44 }
 0x374   : > { %4755 = vmatprep.subr.bf16.mxu0 %v6174_v7  ;;  %v4715_v31 = vpop.f32.mrf.mxu1 }
 0x376   : > { %v4716_v37 = vpop.f32.mrf.mxu1 }
 0x377   : > { %4756 = vmatpush3.bf16.msra.mxu0 %v6181_v10 }
 0x378   : > { %4757 = vmatprep.subr.bf16.mxu0 %v6188_v11  ;;  %v4718_v33 = vpop.f32.mrf.mxu1 }
 0x37a   : > { %v4719_v17 = vpop.f32.mrf.mxu1 }
 0x37b   : > { %4758 = vmatpush3.bf16.msra.mxu0 %v6195_v12  ;;  %v4720_v49 = vadd.f32 %v4719_v17, %v4718_v33 }
 0x37c   : > { %4759 = vmatprep.subr.bf16.mxu0 %v6202_v13  ;;  %v4721_v19 = vpop.f32.mrf.mxu1 }
 0x37e   : > { %v4722_v20 = vpop.f32.mrf.mxu1 }
 0x37f   : > { %4760 = vmatpush3.bf16.msra.mxu0 %v6210_v15  ;;  %v4723_v43 = vadd.f32 %v4722_v20, %v4721_v19 }
 0x380   : > { %5135 = vmatprep.subr.bf16.mxu0 %v5456_v46  ;;  %v4724_v26 = vpop.f32.mrf.mxu1 }
 0x382   : > { %2668 = vmatmul.mubr.bf16.vlgmr.msra.gmra.mxu0 %v5438_v8 }
 0x383   : > { %2675 = vmatprep.mubr.bf16.mxu0 %v5443_v28  ;;  %5136 = vmatpush3.bf16.msra.mxu0 %v5456_v46 }
 0x38a   : > { %2676 = vmatmul.mubr.bf16.gmra.mxu0 %v5445_v23 }
 0x38b   : > { %2683 = vmatprep.mubr.bf16.mxu0 %v5446_v25 }
 0x392   : > { %2684 = vmatmul.mubr.bf16.gmra.mxu0 %v5448_v29  ;;  %v4725_v29 = vpop.f32.mrf.mxu1 }
 0x393   : > { %2691 = vmatprep.mubr.bf16.mxu0 %v5449_v34 }
 0x39a   : > { %2692 = vmatmul.mubr.bf16.gmra.mxu0 %v5452_v36 }
 0x412   : > { %v5081_v41 = vpop.f32.mrf.mxu0 }
 0x413   : > { %v6444_v58 = vadd.f32 %v5081_v41, %v6352_v32 }
 0x414   : > { %v2138_v61 = vpop.f32.mrf.mxu0 }
 0x415   : > { %v6447_v1 = vadd.f32 %v2138_v61, %v6355_v35 }
 0x416   : > { %v5082_v52 = vpop.f32.mrf.mxu0 }
 0x417   : > { %v6450_v18 = vadd.f32 %v5082_v52, %v6358_v38 }
 0x418   : > { %v2141_v57 = vpop.f32.mrf.mxu0 }
 0x419   : > { %v6453_v2 = vadd.f32 %v2141_v57, %v6361_v40 }
 0x41a   : > { %v5085_v62 = vpop.f32.mrf.mxu0 }
 0x41b   : > { %v6456_v59 = vadd.f32 %v5085_v62, %v6364_v42  ;;  %v4708_v42 = vadd.f32 %v4707_v51, %v4706_v48  ;;  %v4717_v48 = vadd.f32 %v4716_v37, %v4715_v31  ;;  %v4726_v51 = vadd.f32 %v4725_v29, %v4724_v26  ;;  %v5454_v29 = vld [vmem:[%s5950_s20 + $0x218] ss:$12 sps:$4 sm:$0xff]  }
 0x41c   : > { %v2154_v32 = vpop.f32.mrf.mxu0 }
 0x41d   : > { %v6459_v4 = vadd.f32 %v2154_v32, %v6367_v45  ;;  %v6470_v45 = vld [vmem:[%s6848_s2] ss:$0 sm:$0xff] }
 0x41e   : > { %v5086_v35 = vpop.f32.mrf.mxu0  ;;  %v2301_v28 = vadd.f32 %v6470_v45, %v4705_v16  ;;  %v2309_v23 = vadd.f32 %v6470_v45, %v4711_v14  ;;  %v2304_v36 = vadd.f32 %v6470_v45, %v4708_v42  ;;  %v2325_v57 = vadd.f32 %v6470_v45, %v4723_v43 }
 0x41f   : > { %v6462_v21 = vadd.f32 %v5086_v35, %v6370_v47  ;;  %v2312_v47 = vadd.f32 %v6470_v45, %v4714_v22  ;;  %v2317_v35 = vadd.f32 %v6470_v45, %v4717_v48  ;;  %v2320_v37 = vadd.f32 %v6470_v45, %v4720_v49 }
 0x420   : > { %v2157_v38 = vpop.f32.mrf.mxu0 }
 0x421   : > { %v6465_v40 = vadd.f32 %v2157_v38, %v6373_v56  ;;  %v2328_v38 = vadd.f32 %v6470_v45, %v4726_v51 }
 0x422   : > { %v5093_v8 = vpop.f32.mrf.mxu0 }
 0x423   : > { %v2374_v39 = vadd.f32 %v5093_v8, %v2309_v23  ;;  %v6487_v23 = vld [vmem:[%s6847_s1 + $0x78] sm:$0xff]  }
 0x424   : > { %v2365_v27 = vpop.f32.mrf.mxu0 }
 0x425   : > { %v2366_v56 = vadd.f32 %v2365_v27, %v2301_v28  ;;  %v2398_v52 = vmax.f32 %v2374_v39, 0.0  ;;  %v5451_v28 = vld [vmem:[%s5950_s20 + $0x1e8] ss:$12 sps:$4 sm:$0xff]   ;;  %v5480_v39 = vld [vmem:[%s6849_s3 + $0x1b8] sm:$0xff]  }
 0x426   : > { %v5094_v25 = vpop.f32.mrf.mxu0 }
 0x427   : > { %v2377_v34 = vadd.f32 %v5094_v25, %v2312_v47  ;;  %v2396_v41 = vmax.f32 %v2366_v56, 0.0  ;;  %v5453_v25 = vld [vmem:[%s5950_s20 + $0x200] ss:$12 sps:$4 sm:$0xff]   ;;  %v5455_v56 = vld [vmem:[%s5950_s20 + $0x230] ss:$12 sps:$4 sm:$0xff]  }
 0x428   : > { %v2368_v46 = vpop.f32.mrf.mxu0 }
 0x429   : > { %v2369_v53 = vadd.f32 %v2368_v46, %v2304_v36  ;;  %v2399_v50 = vmax.f32 %v2377_v34, 0.0 }
 0x42a   : > { %v5097_v44 = vpop.f32.mrf.mxu0 }
 0x42b   : > { %v2397_v61 = vmax.f32 %v2369_v53, 0.0  ;;  %v2405_v16 = vpack.c.bf16 %v2399_v50, %v2398_v52  ;;  %v2390_v33 = vadd.f32 %v5097_v44, %v2325_v57 }
 0x42c   : > { %v2381_v62 = vpop.f32.mrf.mxu0 }
 0x42d   : > { %v2404_v32 = vpack.c.bf16 %v2397_v61, %v2396_v41  ;;  %v2382_v20 = vadd.f32 %v2381_v62, %v2317_v35  ;;  %v2402_v42 = vmax.f32 %v2390_v33, 0.0 }
 0x42e   : > { %v5098_v19 = vpop.f32.mrf.mxu0 }
 0x42f   : > { %v2393_v31 = vadd.f32 %v5098_v19, %v2328_v38  ;;  %5115 = vmatprep.mubr.bf16.mxu1 %v2404_v32  ;;  %v2400_v8 = vmax.f32 %v2382_v20, 0.0 }
 0x430   : > { %v2384_v17 = vpop.f32.mrf.mxu0  ;;  %5116 = vmatmul.mubr.bf16.vlgmr.msra.gmra.mxu1 %v2405_v16 }
 0x431   : > { %v2385_v22 = vadd.f32 %v2384_v17, %v2320_v37  ;;  %5124 = vmatpush3.bf16.msra.mxu1 %v6250_v30  ;;  %v2403_v14 = vmax.f32 %v2393_v31, 0.0 }
 0x432   : > { %5125 = vmatprep.subr.bf16.mxu1 %v6285_v24 }
 0x433   : > { %v2401_v26 = vmax.f32 %v2385_v22, 0.0  ;;  %v2407_v47 = vpack.c.bf16 %v2403_v14, %v2402_v42 }
 0x435   : > { %v2406_v27 = vpack.c.bf16 %v2401_v26, %v2400_v8  ;;  %5126 = vmatpush3.bf16.msra.mxu1 %v6285_v24 }
 0x436   : > { %4803 = vmatprep.subr.bf16.mxu1 %v6487_v23 }
 0x437   : > { %5119 = vmatprep.mubr.bf16.mxu1 %v2406_v27 }
 0x438   : > { %5120 = vmatmul.mubr.bf16.gmra.mxu1 %v2407_v47 }
 0x439   : > { %5127 = vmatprep.mubr.msk.bf16.mxu1 %vm794_vm0, %v5451_v28 }
 0x440   : > { %5128 = vmatmul.mubr.msk.bf16.vlgmr.msra.gmra.mxu1 %vm794_vm0, %v5453_v25 }
 0x441   : > { %5131 = vmatprep.mubr.msk.bf16.mxu1 %vm794_vm0, %v5454_v29  ;;  %4804 = vmatpush3.bf16.msra.mxu1 %v6107_v54  ;;  %v5457_v54 = vld [vmem:[%s6849_s3 + $0x170] sm:$0xff]  }
 0x442   : > { %4805 = vmatprep.subr.bf16.mxu1 %v6113_v55  ;;  %5137 = vmatprep.subr.bf16.mxu0 %v5457_v54  ;;  %v5458_v55 = vld [vmem:[%s6849_s3 + $0x168] sm:$0xff]   ;;  %v4761_v34 = vpop.f32.mrf.mxu0 }
 0x443   : > { %5138 = vmatpush3.bf16.msra.mxu0 %v5457_v54 }
 0x444   : > { %5139 = vmatprep.subr.bf16.mxu0 %v5458_v55  ;;  %v4762_v36 = vpop.f32.mrf.mxu0 }
 0x445   : > { %4806 = vmatpush3.bf16.msra.mxu1 %v6122_v60  ;;  %v5459_v60 = vld [vmem:[%s6849_s3 + $0x160] sm:$0xff]   ;;  %v4763_v22 = vadd.f32 %v4762_v36, %v4761_v34 }
 0x446   : > { %4807 = vmatprep.subr.bf16.mxu1 %v6130_v63  ;;  %v5460_v63 = vld [vmem:[%s6849_s3 + $0x158] sm:$0xff]   ;;  %v4764_v43 = vpop.f32.mrf.mxu0 }
 0x447   : > { %5140 = vmatpush3.bf16.msra.mxu0 %v5458_v55  ;;  %v2670_v28 = vadd.f32 %v6470_v45, %v4763_v22  ;;  %v5537_v22 = vld [vmem:[%s6847_s1 + $0x28] sm:$0xff]  }
 0x448   : > { %5132 = vmatmul.mubr.msk.bf16.gmra.mxu1 %vm794_vm0, %v5455_v56  ;;  %5141 = vmatprep.subr.bf16.mxu0 %v5459_v60  ;;  %v4765_v46 = vpop.f32.mrf.mxu0 }
 0x449   : > { %4808 = vmatpush3.bf16.msra.mxu1 %v6138_v3  ;;  %v5461_v3 = vld [vmem:[%s6849_s3 + $0x150] sm:$0xff]  }
 0x44a   : > { %4809 = vmatprep.subr.bf16.mxu1 %v6144_v5  ;;  %v5464_v5 = vld [vmem:[%s5950_s20 + $0x244] ss:$12 sps:$4 sm:$0xff]  }
 0x44b   : > { %5142 = vmatpush3.bf16.msra.mxu0 %v5459_v60  ;;  %3036 = vmatprep.mubr.bf16.mxu1 %v5464_v5 }
 0x44c   : > { %5143 = vmatprep.subr.bf16.mxu0 %v5460_v63 }
 0x44d   : > { %4810 = vmatpush3.bf16.msra.mxu1 %v6153_v6  ;;  %v5462_v6 = vld [vmem:[%s5950_s20 + $0x240] ss:$12 sps:$4 sm:$0xff]  }
 0x44e   : > { %4811 = vmatprep.subr.bf16.mxu1 %v6160_v0  ;;  %v5465_v0 = vld [vmem:[%s6849_s3 + $0x148] sm:$0xff]  }
 0x44f   : > { %5144 = vmatpush3.bf16.msra.mxu0 %v5460_v63 }
 0x450   : > { %5145 = vmatprep.subr.bf16.mxu0 %v5461_v3 }
 0x451   : > { %4812 = vmatpush3.bf16.msra.mxu1 %v6167_v9  ;;  %v5466_v9 = vld [vmem:[%s6849_s3 + $0x140] sm:$0xff]  }
 0x452   : > { %4813 = vmatprep.subr.bf16.mxu1 %v6174_v7  ;;  %v5467_v7 = vld [vmem:[%s5950_s20 + $0x25c] ss:$12 sps:$4 sm:$0xff]  }
 0x453   : > { %5146 = vmatpush3.bf16.msra.mxu0 %v5461_v3 }
 0x454   : > { %5147 = vmatprep.subr.bf16.mxu0 %v5465_v0 }
 0x455   : > { %4814 = vmatpush3.bf16.msra.mxu1 %v6181_v10  ;;  %v5469_v10 = vld [vmem:[%s5950_s20 + $0x258] ss:$12 sps:$4 sm:$0xff]  }
 0x456   : > { %4815 = vmatprep.subr.bf16.mxu1 %v6188_v11  ;;  %v5470_v11 = vld [vmem:[%s5950_s20 + $0x274] ss:$12 sps:$4 sm:$0xff]  }
 0x457   : > { %5148 = vmatpush3.bf16.msra.mxu0 %v5465_v0 }
 0x458   : > { %5149 = vmatprep.subr.bf16.mxu0 %v5466_v9 }
 0x459   : > { %4816 = vmatpush3.bf16.msra.mxu1 %v6195_v12  ;;  %v5472_v12 = vld [vmem:[%s5950_s20 + $0x270] ss:$12 sps:$4 sm:$0xff]  }
 0x45a   : > { %4817 = vmatprep.subr.bf16.mxu1 %v6202_v13  ;;  %v5473_v13 = vld [vmem:[%s5950_s20 + $0x28c] ss:$12 sps:$4 sm:$0xff]  }
 0x45b   : > { %5150 = vmatpush3.bf16.msra.mxu0 %v5466_v9 }
 0x45c   : > { %5159 = vmatprep.subr.bf16.mxu0 %v6250_v30  ;;  %v4767_v30 = vpop.f32.mrf.mxu0 }
 0x45d   : > { %4818 = vmatpush3.bf16.msra.mxu1 %v6210_v15  ;;  %v5476_v15 = vld [vmem:[%s5950_s20 + $0x288] ss:$12 sps:$4 sm:$0xff]  }
 0x45e   : > { %5171 = vmatprep.subr.bf16.mxu1 %v5480_v39  ;;  %v4768_v48 = vpop.f32.mrf.mxu0 }
 0x45f   : > { %v4769_v8 = vadd.f32 %v4768_v48, %v4767_v30 }
 0x460   : > { %3037 = vmatmul.mubr.bf16.vlgmr.msra.gmra.mxu1 %v5462_v6  ;;  %v4770_v51 = vpop.f32.mrf.mxu0 }
 0x461   : > { %3044 = vmatprep.mubr.bf16.mxu1 %v5467_v7  ;;  %5172 = vmatpush3.bf16.msra.mxu1 %v5480_v39  ;;  %v2678_v47 = vadd.f32 %v6470_v45, %v4769_v8  ;;  %v5539_v8 = vld [vmem:[%s6847_s1 + $0x20] sm:$0xff]  }
 0x462   : > { %v4771_v53 = vpop.f32.mrf.mxu0 }
 0x463   : > { %v4772_v14 = vadd.f32 %v4771_v53, %v4770_v51 }
 0x464   : > { %v4773_v50 = vpop.f32.mrf.mxu0 }
 0x466   : > { %v4774_v44 = vpop.f32.mrf.mxu0 }
 0x467   : > { %v4775_v63 = vadd.f32 %v4774_v44, %v4773_v50  ;;  %v6580_v44 = vld [vmem:[%s6847_s1 + $0x88] sm:$0xff]  }
 0x468   : > { %3045 = vmatmul.mubr.bf16.gmra.mxu1 %v5469_v10  ;;  %v4776_v41 = vpop.f32.mrf.mxu0 }
 0x469   : > { %3052 = vmatprep.mubr.bf16.mxu1 %v5470_v11  ;;  %v2686_v34 = vadd.f32 %v6470_v45, %v4775_v63  ;;  %v5489_v63 = vld [vmem:[%s6849_s3 + $0x188] sm:$0xff]  }
 0x46a   : > { %v4777_v32 = vpop.f32.mrf.mxu0 }
 0x46b   : > { %v4778_v9 = vadd.f32 %v4777_v32, %v4776_v41 }
 0x46c   : > { %v4779_v20 = vpop.f32.mrf.mxu0 }
 0x46d   : > { %v2689_v48 = vadd.f32 %v6470_v45, %v4778_v9  ;;  %v5494_v9 = vld [vmem:[%s5950_s20 + $0x2d0] ss:$12 sps:$4 sm:$0xff]  }
 0x46e   : > { %v4780_v33 = vpop.f32.mrf.mxu0 }
 0x470   : > { %3053 = vmatmul.mubr.bf16.gmra.mxu1 %v5472_v12  ;;  %v4782_v42 = vpop.f32.mrf.mxu0 }
 0x471   : > { %3060 = vmatprep.mubr.bf16.mxu1 %v5473_v13 }
 0x478   : > { %3061 = vmatmul.mubr.bf16.gmra.mxu1 %v5476_v15 }
 0x4f0   : > { %v5117_v49 = vpop.f32.mrf.mxu1 }
 0x4f1   : > { %v6546_v61 = vadd.f32 %v5117_v49, %v6444_v58 }
 0x4f2   : > { %v2507_v52 = vpop.f32.mrf.mxu1 }
 0x4f3   : > { %v6549_v57 = vadd.f32 %v2507_v52, %v6447_v1 }
 0x4f4   : > { %v5118_v62 = vpop.f32.mrf.mxu1 }
 0x4f5   : > { %v6552_v35 = vadd.f32 %v5118_v62, %v6450_v18 }
 0x4f6   : > { %v2510_v38 = vpop.f32.mrf.mxu1 }
 0x4f7   : > { %v6555_v16 = vadd.f32 %v2510_v38, %v6453_v2  ;;  %v5475_v38 = vld [vmem:[%s5950_s20 + $0x248] ss:$12 sps:$4 sm:$0xff]  }
 0x4f8   : > { %v5121_v19 = vpop.f32.mrf.mxu1 }
 0x4f9   : > { %v6558_v31 = vadd.f32 %v5121_v19, %v6456_v59  ;;  %v4766_v59 = vadd.f32 %v4765_v46, %v4764_v43 }
 0x4fa   : > { %v2523_v58 = vpop.f32.mrf.mxu1 }
 0x4fb   : > { %v6561_v37 = vadd.f32 %v2523_v58, %v6459_v4  ;;  %v2681_v4 = vadd.f32 %v6470_v45, %v4772_v14  ;;  %v2673_v54 = vadd.f32 %v6470_v45, %v4766_v59  ;;  %v5478_v58 = vld [vmem:[%s5950_s20 + $0x278] ss:$12 sps:$4 sm:$0xff]   ;;  %v5542_v59 = vld [vmem:[%s6847_s1 + $0x50] sm:$0xff]  }
 0x4fc   : > { %v5122_v1 = vpop.f32.mrf.mxu1  ;;  %v5538_v14 = vld [vmem:[%s6847_s1 + $0x60] sm:$0xff]  }
 0x4fd   : > { %v6564_v17 = vadd.f32 %v5122_v1, %v6462_v21  ;;  %v4783_v21 = vpop.f32.mrf.mxu0  ;;  %v5533_v1 = vld [vmem:[%s6847_s1 + $0x38] sm:$0xff]  }
 0x4fe   : > { %v2526_v18 = vpop.f32.mrf.mxu1  ;;  %v4784_v3 = vadd.f32 %v4783_v21, %v4782_v42  ;;  %v5541_v42 = vld [vmem:[%s6847_s1 + $0x18] sm:$0xff]   ;;  %v5481_v21 = vld [vmem:[%s6849_s3 + $0x1b0] sm:$0xff]  }
 0x4ff   : > { %v6567_v2 = vadd.f32 %v2526_v18, %v6465_v40  ;;  %v4781_v40 = vadd.f32 %v4780_v33, %v4779_v20  ;;  %v5477_v20 = vld [vmem:[%s5950_s20 + $0x260] ss:$12 sps:$4 sm:$0xff]   ;;  %v5535_v33 = vld [vmem:[%s6847_s1 + $0x30] sm:$0xff]   ;;  %5173 = vmatprep.subr.bf16.mxu1 %v5481_v21 }
 0x500   : > { %v5129_v26 = vpop.f32.mrf.mxu1  ;;  %v2697_v36 = vadd.f32 %v6470_v45, %v4784_v3  ;;  %v5536_v18 = vld [vmem:[%s6847_s1 + $0x68] sm:$0xff]   ;;  %5174 = vmatpush3.bf16.msra.mxu1 %v5481_v21  ;;  %v5490_v3 = vld [vmem:[%s6849_s3 + $0x180] sm:$0xff]  }
 0x501   : > { %v2743_v55 = vadd.f32 %v5129_v26, %v2678_v47  ;;  %v2694_v12 = vadd.f32 %v6470_v45, %v4781_v40  ;;  %v5540_v26 = vld [vmem:[%s6847_s1 + $0x58] sm:$0xff]   ;;  %v5546_v47 = vld [vmem:[%s6847_s1 + $0x40] sm:$0xff]  }
 0x502   : > { %v2734_v27 = vpop.f32.mrf.mxu1  ;;  %v5488_v40 = vld [vmem:[%s5950_s20 + $0x2a4] ss:$12 sps:$4 sm:$0xff]  }
 0x503   : > { %v2735_v29 = vadd.f32 %v2734_v27, %v2670_v28  ;;  %v2767_v11 = vmax.f32 %v2743_v55, 0.0  ;;  %v5543_v27 = vld [vmem:[%s6847_s1 + $0x10] sm:$0xff]   ;;  %v5544_v28 = vld [vmem:[%s6847_s1 + $0x48] sm:$0xff]  }
 0x504   : > { %v5130_v25 = vpop.f32.mrf.mxu1  ;;  %v5485_v55 = vld [vmem:[%s6849_s3 + $0x190] sm:$0xff]  }
 0x505   : > { %v2746_v56 = vadd.f32 %v5130_v25, %v2681_v4  ;;  %v2765_v7 = vmax.f32 %v2735_v29, 0.0  ;;  %v5545_v4 = vld [vmem:[%s6847_s1 + $0x8] sm:$0xff]   ;;  %v5547_v25 = vld [vmem:[%s6847_s1] sm:$0xff]  }
 0x506   : > { %v2737_v60 = vpop.f32.mrf.mxu1  ;;  %v5482_v29 = vld [vmem:[%s6849_s3 + $0x1a8] sm:$0xff]  }
 0x507   : > { %v2738_v5 = vadd.f32 %v2737_v60, %v2673_v54  ;;  %v2768_v6 = vmax.f32 %v2746_v56, 0.0  ;;  %5175 = vmatprep.subr.bf16.mxu1 %v5482_v29  ;;  %v5483_v56 = vld [vmem:[%s6849_s3 + $0x1a0] sm:$0xff]   ;;  %v5484_v54 = vld [vmem:[%s6849_s3 + $0x198] sm:$0xff]  }
 0x508   : > { %v5133_v0 = vpop.f32.mrf.mxu1  ;;  %5176 = vmatpush3.bf16.msra.mxu1 %v5482_v29  ;;  %v5486_v60 = vld [vmem:[%s5950_s20 + $0x2a0] ss:$12 sps:$4 sm:$0xff]  }
 0x509   : > { %v2766_v10 = vmax.f32 %v2738_v5, 0.0  ;;  %v2774_v39 = vpack.c.bf16 %v2768_v6, %v2767_v11  ;;  %v2759_v51 = vadd.f32 %v5133_v0, %v2694_v12  ;;  %5177 = vmatprep.subr.bf16.mxu1 %v5483_v56  ;;  %v5491_v5 = vld [vmem:[%s5950_s20 + $0x2bc] ss:$12 sps:$4 sm:$0xff]   ;;  %v5493_v6 = vld [vmem:[%s5950_s20 + $0x2b8] ss:$12 sps:$4 sm:$0xff]  }
 0x50a   : > { %v2750_v13 = vpop.f32.mrf.mxu1  ;;  %v5496_v0 = vld [vmem:[%s5950_s20 + $0x2d4] ss:$12 sps:$4 sm:$0xff]  }
 0x50b   : > { %v2773_v15 = vpack.c.bf16 %v2766_v10, %v2765_v7  ;;  %v2751_v46 = vadd.f32 %v2750_v13, %v2686_v34  ;;  %v2771_v62 = vmax.f32 %v2759_v51, 0.0  ;;  %v5499_v7 = vld [vmem:[%s5950_s20 + $0x2ec] ss:$12 sps:$4 sm:$0xff]   ;;  %v5497_v10 = vld [vmem:[%s5950_s20 + $0x2e8] ss:$12 sps:$4 sm:$0xff]  }
 0x50c   : > { %v5134_v43 = vpop.f32.mrf.mxu1  ;;  %5178 = vmatpush3.bf16.msra.mxu1 %v5483_v56  ;;  %v5504_v13 = vld [vmem:[%s6849_s3 + $0x1f8] sm:$0xff]  }
 0x50d   : > { %v2762_v30 = vadd.f32 %v5134_v43, %v2697_v36  ;;  %5151 = vmatprep.mubr.bf16.mxu0 %v2773_v15  ;;  %v2769_v41 = vmax.f32 %v2751_v46, 0.0  ;;  %5179 = vmatprep.subr.bf16.mxu1 %v5484_v54 }
 0x50e   : > { %v2753_v53 = vpop.f32.mrf.mxu1  ;;  %5152 = vmatmul.mubr.bf16.vlgmr.msra.gmra.mxu0 %v2774_v39 }
 0x50f   : > { %v2754_v50 = vadd.f32 %v2753_v53, %v2689_v48  ;;  %5160 = vmatpush3.bf16.msra.mxu0 %v6580_v44  ;;  %v2772_v49 = vmax.f32 %v2762_v30, 0.0 }
 0x510   : > { %5161 = vmatprep.subr.bf16.mxu0 %v6285_v24  ;;  %5180 = vmatpush3.bf16.msra.mxu1 %v5484_v54 }
 0x511   : > { %v2770_v52 = vmax.f32 %v2754_v50, 0.0  ;;  %v2776_v19 = vpack.c.bf16 %v2772_v49, %v2771_v62  ;;  %5181 = vmatprep.subr.bf16.mxu1 %v5485_v55 }
 0x513   : > { %v2775_v32 = vpack.c.bf16 %v2770_v52, %v2769_v41  ;;  %5162 = vmatpush3.bf16.msra.mxu0 %v6285_v24  ;;  %v5534_v24 = vld [vmem:[%s6847_s1 + $0x70] sm:$0xff]  }
 0x514   : > { %4861 = vmatprep.subr.bf16.mxu0 %v6487_v23  ;;  %v5479_v23 = vld [vmem:[%s5950_s20 + $0x290] ss:$12 sps:$4 sm:$0xff]   ;;  %5182 = vmatpush3.bf16.msra.mxu1 %v5485_v55 }
 0x515   : > { %5155 = vmatprep.mubr.bf16.mxu0 %v2775_v32  ;;  %5183 = vmatprep.subr.bf16.mxu1 %v5489_v63 }
 0x516   : > { %5156 = vmatmul.mubr.bf16.gmra.mxu0 %v2776_v19 }
 0x517   : > { %5163 = vmatprep.mubr.msk.bf16.mxu0 %vm794_vm0, %v5475_v38 }
 0x518   : > { %5184 = vmatpush3.bf16.msra.mxu1 %v5489_v63 }
 0x519   : > { %5185 = vmatprep.subr.bf16.mxu1 %v5490_v3 }
 0x51c   : > { %5186 = vmatpush3.bf16.msra.mxu1 %v5490_v3 }
 0x51d   : > { %5195 = vmatprep.subr.bf16.mxu1 %v6580_v44 }
 0x51e   : > { %5164 = vmatmul.mubr.msk.bf16.vlgmr.msra.gmra.mxu0 %vm794_vm0, %v5477_v20 }
 0x51f   : > { %5167 = vmatprep.mubr.msk.bf16.mxu0 %vm794_vm0, %v5478_v58  ;;  %4862 = vmatpush3.bf16.msra.mxu0 %v5533_v1 }
 0x520   : > { %4863 = vmatprep.subr.bf16.mxu0 %v5534_v24  ;;  %v4819_v11 = vpop.f32.mrf.mxu1 }
 0x522   : > { %v4820_v12 = vpop.f32.mrf.mxu1 }
 0x523   : > { %4864 = vmatpush3.bf16.msra.mxu0 %v5535_v33 }
 0x524   : > { %4865 = vmatprep.subr.bf16.mxu0 %v5536_v18  ;;  %v4822_v15 = vpop.f32.mrf.mxu1  ;;  %v4821_v18 = vadd.f32 %v4820_v12, %v4819_v11 }
 0x526   : > { %5168 = vmatmul.mubr.msk.bf16.gmra.mxu0 %vm794_vm0, %v5479_v23  ;;  %v4823_v34 = vpop.f32.mrf.mxu1 }
 0x527   : > { %4866 = vmatpush3.bf16.msra.mxu0 %v5537_v22  ;;  %3405 = vmatprep.mubr.bf16.mxu0 %v5488_v40 }
 0x528   : > { %4867 = vmatprep.subr.bf16.mxu0 %v5538_v14  ;;  %v4825_v36 = vpop.f32.mrf.mxu1 }
 0x52a   : > { %v4826_v39 = vpop.f32.mrf.mxu1 }
 0x52b   : > { %4868 = vmatpush3.bf16.msra.mxu0 %v5539_v8  ;;  %v4827_v14 = vadd.f32 %v4826_v39, %v4825_v36 }
 0x52c   : > { %4869 = vmatprep.subr.bf16.mxu0 %v5540_v26  ;;  %v4828_v43 = vpop.f32.mrf.mxu1 }
 0x52e   : > { %v4829_v46 = vpop.f32.mrf.mxu1 }
 0x52f   : > { %4870 = vmatpush3.bf16.msra.mxu0 %v5541_v42  ;;  %v4830_v22 = vadd.f32 %v4829_v46, %v4828_v43 }
 0x530   : > { %4871 = vmatprep.subr.bf16.mxu0 %v5542_v59  ;;  %v4831_v30 = vpop.f32.mrf.mxu1  ;;  %v3039_v59 = vadd.f32 %v6470_v45, %v4821_v18  ;;  %v5509_v18 = vld [vmem:[%s6849_s3 + $0x1d0] sm:$0xff]  }
 0x532   : > { %v4832_v48 = vpop.f32.mrf.mxu1 }
 0x533   : > { %4872 = vmatpush3.bf16.msra.mxu0 %v5543_v27  ;;  %v3047_v27 = vadd.f32 %v6470_v45, %v4827_v14  ;;  %v4833_v56 = vadd.f32 %v4832_v48, %v4831_v30  ;;  %v5548_v48 = vld [vmem:[%s6847_s1 + $0x80] sm:$0xff]  }
 0x534   : > { %4873 = vmatprep.subr.bf16.mxu0 %v5544_v28  ;;  %v4834_v53 = vpop.f32.mrf.mxu1  ;;  %v5511_v14 = vld [vmem:[%s6849_s3 + $0x1c0] sm:$0xff]  }
 0x536   : > { %v4835_v62 = vpop.f32.mrf.mxu1 }
 0x537   : > { %4874 = vmatpush3.bf16.msra.mxu0 %v5545_v4  ;;  %v4836_v63 = vadd.f32 %v4835_v62, %v4834_v53  ;;  %v5500_v62 = vld [vmem:[%s5950_s20 + $0x2a8] ss:$12 sps:$4 sm:$0xff]  }
 0x538   : > { %4875 = vmatprep.subr.bf16.mxu0 %v5546_v47  ;;  %v4837_v58 = vpop.f32.mrf.mxu1 }
 0x539   : > { %v3058_v36 = vadd.f32 %v6470_v45, %v4836_v63 }
 0x53a   : > { %v4838_v23 = vpop.f32.mrf.mxu1 }
 0x53b   : > { %4876 = vmatpush3.bf16.msra.mxu0 %v5547_v25 }
 0x53c   : > { %5207 = vmatprep.subr.bf16.mxu0 %v5504_v13  ;;  %v4840_v26 = vpop.f32.mrf.mxu1 }
 0x53e   : > { %3406 = vmatmul.mubr.bf16.vlgmr.msra.gmra.mxu0 %v5486_v60 }
 0x53f   : > { %3413 = vmatprep.mubr.bf16.mxu0 %v5491_v5  ;;  %5208 = vmatpush3.bf16.msra.mxu0 %v5504_v13 }
 0x546   : > { %3414 = vmatmul.mubr.bf16.gmra.mxu0 %v5493_v6 }
 0x547   : > { %3421 = vmatprep.mubr.bf16.mxu0 %v5496_v0 }
 0x54e   : > { %3422 = vmatmul.mubr.bf16.gmra.mxu0 %v5494_v9 }
 0x54f   : > { %3429 = vmatprep.mubr.bf16.mxu0 %v5499_v7 }
 0x556   : > { %3430 = vmatmul.mubr.bf16.gmra.mxu0 %v5497_v10  ;;  %v3055_v10 = vadd.f32 %v6470_v45, %v4833_v56 }
 0x5ce   : > { %v5153_v51 = vpop.f32.mrf.mxu0 }
 0x5cf   : > { %v6673_v50 = vadd.f32 %v5153_v51, %v6546_v61 }
 0x5d0   : > { %v2876_v49 = vpop.f32.mrf.mxu0 }
 0x5d1   : > { %v6676_v41 = vadd.f32 %v2876_v49, %v6549_v57 }
 0x5d2   : > { %v5154_v52 = vpop.f32.mrf.mxu0 }
 0x5d3   : > { %v6679_v32 = vadd.f32 %v5154_v52, %v6552_v35 }
 0x5d4   : > { %v2879_v38 = vpop.f32.mrf.mxu0 }
 0x5d5   : > { %v6682_v19 = vadd.f32 %v2879_v38, %v6555_v16 }
 0x5d6   : > { %v5157_v20 = vpop.f32.mrf.mxu0 }
 0x5d7   : > { %v6685_v1 = vadd.f32 %v5157_v20, %v6558_v31  ;;  %v4824_v31 = vadd.f32 %v4823_v34, %v4822_v15  ;;  %v5501_v20 = vld [vmem:[%s5950_s20 + $0x2c0] ss:$12 sps:$4 sm:$0xff]  }
 0x5d8   : > { %v2892_v61 = vpop.f32.mrf.mxu0 }
 0x5d9   : > { %v6688_v24 = vadd.f32 %v2892_v61, %v6561_v37  ;;  %v3050_v37 = vadd.f32 %v6470_v45, %v4830_v22  ;;  %v3042_v25 = vadd.f32 %v6470_v45, %v4824_v31  ;;  %v5505_v61 = vld [vmem:[%s6849_s3 + $0x1f0] sm:$0xff]   ;;  %v5510_v22 = vld [vmem:[%s6849_s3 + $0x1c8] sm:$0xff]  }
 0x5da   : > { %v5158_v57 = vpop.f32.mrf.mxu0  ;;  %5209 = vmatprep.subr.bf16.mxu0 %v5505_v61  ;;  %v3689_v31 = vld [vmem:[%s6851_s5 + $0x68] sm:$0xff] }
 0x5db   : > { %v6691_v33 = vadd.f32 %v5158_v57, %v6564_v17  ;;  %v4841_v17 = vpop.f32.mrf.mxu1  ;;  %5210 = vmatpush3.bf16.msra.mxu0 %v5505_v61  ;;  %v5506_v57 = vld [vmem:[%s6849_s3 + $0x1e8] sm:$0xff]  }
 0x5dc   : > { %v2895_v35 = vpop.f32.mrf.mxu0  ;;  %v4842_v54 = vadd.f32 %v4841_v17, %v4840_v26  ;;  %5211 = vmatprep.subr.bf16.mxu0 %v5506_v57  ;;  %v3690_v26 = vld [vmem:[%s6851_s5 + $0x70] sm:$0xff]  ;;  %v3683_v17 = vld [vmem:[%s6851_s5 + $0x38] sm:$0xff] }
 0x5dd   : > { %v6694_v16 = vadd.f32 %v2895_v35, %v6567_v2  ;;  %v4839_v2 = vadd.f32 %v4838_v23, %v4837_v58  ;;  %v5503_v58 = vld [vmem:[%s5950_s20 + $0x2f0] ss:$12 sps:$4 sm:$0xff]   ;;  %v5507_v23 = vld [vmem:[%s6849_s3 + $0x1e0] sm:$0xff]  }
 0x5de   : > { %v5165_v8 = vpop.f32.mrf.mxu0  ;;  %v3066_v11 = vadd.f32 %v6470_v45, %v4842_v54  ;;  %v5508_v35 = vld [vmem:[%s6849_s3 + $0x1d8] sm:$0xff]  }
 0x5df   : > { %v3112_v21 = vadd.f32 %v5165_v8, %v3047_v27  ;;  %v3063_v0 = vadd.f32 %v6470_v45, %v4839_v2  ;;  %5212 = vmatpush3.bf16.msra.mxu0 %v5506_v57  ;;  %v3691_v8 = vld [vmem:[%s6851_s5 + $0x78] sm:$0xff]  ;;  %v3685_v27 = vld [vmem:[%s6851_s5 + $0x48] sm:$0xff] }
 0x5e0   : > { %v3103_v42 = vpop.f32.mrf.mxu0  ;;  %5213 = vmatprep.subr.bf16.mxu0 %v5507_v23 }
 0x5e1   : > { %v3104_v4 = vadd.f32 %v3103_v42, %v3039_v59  ;;  %v3136_v6 = vmax.f32 %v3112_v21, 0.0  ;;  %v3688_v42 = vld [vmem:[%s6851_s5 + $0x60] sm:$0xff]  ;;  %v3687_v59 = vld [vmem:[%s6851_s5 + $0x58] sm:$0xff] }
 0x5e2   : > { %v5166_v28 = vpop.f32.mrf.mxu0 }
 0x5e3   : > { %v3115_v47 = vadd.f32 %v5166_v28, %v3050_v37  ;;  %v3134_v3 = vmax.f32 %v3104_v4, 0.0  ;;  %5214 = vmatpush3.bf16.msra.mxu0 %v5507_v23  ;;  %v3686_v37 = vld [vmem:[%s6851_s5 + $0x50] sm:$0xff]  ;;  %v3684_v28 = vld [vmem:[%s6851_s5 + $0x40] sm:$0xff] }
 0x5e4   : > { %v3106_v29 = vpop.f32.mrf.mxu0  ;;  %5215 = vmatprep.subr.bf16.mxu0 %v5508_v35  ;;  %v3682_v4 = vld [vmem:[%s6851_s5 + $0x30] sm:$0xff] }
 0x5e5   : > { %v3107_v55 = vadd.f32 %v3106_v29, %v3042_v25  ;;  %v3137_v40 = vmax.f32 %v3115_v47, 0.0 }
 0x5e6   : > { %v5169_v60 = vpop.f32.mrf.mxu0 }
 0x5e7   : > { %v3135_v5 = vmax.f32 %v3107_v55, 0.0  ;;  %v3143_v12 = vpack.c.bf16 %v3137_v40, %v3136_v6  ;;  %v3128_v39 = vadd.f32 %v5169_v60, %v3063_v0  ;;  %5216 = vmatpush3.bf16.msra.mxu0 %v5508_v35 }
 0x5e8   : > { %v3119_v9 = vpop.f32.mrf.mxu0  ;;  %5217 = vmatprep.subr.bf16.mxu0 %v5509_v18 }
 0x5e9   : > { %v3142_v7 = vpack.c.bf16 %v3135_v5, %v3134_v3  ;;  %v3120_v15 = vadd.f32 %v3119_v9, %v3055_v10  ;;  %v3140_v49 = vmax.f32 %v3128_v39, 0.0 }
 0x5ea   : > { %v5170_v13 = vpop.f32.mrf.mxu0 }
 0x5eb   : > { %v3131_v34 = vadd.f32 %v5170_v13, %v3066_v11  ;;  %5187 = vmatprep.mubr.bf16.mxu1 %v3142_v7  ;;  %v3138_v51 = vmax.f32 %v3120_v15, 0.0  ;;  %5218 = vmatpush3.bf16.msra.mxu0 %v5509_v18 }
 0x5ec   : > { %v3122_v43 = vpop.f32.mrf.mxu0  ;;  %5188 = vmatmul.mubr.bf16.vlgmr.msra.gmra.mxu1 %v3143_v12  ;;  %5219 = vmatprep.subr.bf16.mxu0 %v5510_v22 }
 0x5ed   : > { %v3123_v46 = vadd.f32 %v3122_v43, %v3058_v36  ;;  %5196 = vmatpush3.bf16.msra.mxu1 %v6580_v44  ;;  %v3141_v30 = vmax.f32 %v3131_v34, 0.0  ;;  %v5502_v44 = vld [vmem:[%s5950_s20 + $0x2d8] ss:$12 sps:$4 sm:$0xff]  }
 0x5ee   : > { %5197 = vmatprep.subr.bf16.mxu1 %v5548_v48 }
 0x5ef   : > { %v3139_v53 = vmax.f32 %v3123_v46, 0.0  ;;  %v3145_v38 = vpack.c.bf16 %v3141_v30, %v3140_v49  ;;  %5220 = vmatpush3.bf16.msra.mxu0 %v5510_v22 }
 0x5f0   : > { %5221 = vmatprep.subr.bf16.mxu0 %v5511_v14 }
 0x5f1   : > { %v3144_v52 = vpack.c.bf16 %v3139_v53, %v3138_v51  ;;  %5198 = vmatpush3.bf16.msra.mxu1 %v5548_v48 }
 0x5f2   : > { %5231 = vmatprep.subr.mxu1 %v3691_v8 }
 0x5f3   : > { %5191 = vmatprep.mubr.bf16.mxu1 %v3144_v52  ;;  %5222 = vmatpush3.bf16.msra.mxu0 %v5511_v14 }
 0x5f4   : > { %5192 = vmatmul.mubr.bf16.gmra.mxu1 %v3145_v38 }
 0x5f5   : > { %5199 = vmatprep.mubr.msk.bf16.mxu1 %vm794_vm0, %v5500_v62 }
 0x5fc   : > { %5200 = vmatmul.mubr.msk.bf16.vlgmr.msra.gmra.mxu1 %vm794_vm0, %v5501_v20 }
 0x5fd   : > { %5203 = vmatprep.mubr.msk.bf16.mxu1 %vm794_vm0, %v5502_v44  ;;  %5232 = vmatpush3.msra.mxu1 %v3691_v8 }
 0x5fe   : > { %5233 = vmatprep.subr.mxu1 %v3690_v26  ;;  %v4877_v47 = vpop.f32.mrf.mxu0 }
 0x5ff   : > { %5234 = vmatpush3.msra.mxu1 %v3690_v26 }
 0x600   : > { %5235 = vmatprep.subr.mxu1 %v3689_v31  ;;  %v4878_v25 = vpop.f32.mrf.mxu0 }
 0x601   : > { %5236 = vmatpush3.msra.mxu1 %v3689_v31  ;;  %v4879_v46 = vadd.f32 %v4878_v25, %v4877_v47 }
 0x602   : > { %5237 = vmatprep.subr.mxu1 %v3688_v42  ;;  %v4880_v21 = vpop.f32.mrf.mxu0 }
 0x603   : > { %5238 = vmatpush3.msra.mxu1 %v3688_v42  ;;  %v3408_v52 = vadd.f32 %v6470_v45, %v4879_v46  ;;  %v4451_v46 = vld [vmem:[%s6850_s4] ss:$0 sm:$0xff] }
 0x604   : > { %5204 = vmatmul.mubr.msk.bf16.gmra.mxu1 %vm794_vm0, %v5503_v58  ;;  %5239 = vmatprep.subr.mxu1 %v3687_v59  ;;  %v4881_v2 = vpop.f32.mrf.mxu0 }
 0x605   : > { %5240 = vmatpush3.msra.mxu1 %v3687_v59 }
 0x606   : > { %5241 = vmatprep.subr.mxu1 %v3686_v37  ;;  %v4883_v29 = vpop.f32.mrf.mxu0 }
 0x607   : > { %5242 = vmatpush3.msra.mxu1 %v3686_v37 }
 0x608   : > { %5243 = vmatprep.subr.mxu1 %v3685_v27  ;;  %v4884_v56 = vpop.f32.mrf.mxu0 }
 0x609   : > { %5244 = vmatpush3.msra.mxu1 %v3685_v27  ;;  %v4885_v48 = vadd.f32 %v4884_v56, %v4883_v29 }
 0x60a   : > { %5245 = vmatprep.subr.mxu1 %v3684_v28  ;;  %v4886_v54 = vpop.f32.mrf.mxu0 }
 0x60b   : > { %5246 = vmatpush3.msra.mxu1 %v3684_v28  ;;  %v3416_v62 = vadd.f32 %v6470_v45, %v4885_v48 }
 0x60c   : > { %5247 = vmatprep.subr.mxu1 %v3683_v17  ;;  %v4887_v55 = vpop.f32.mrf.mxu0 }
 0x60d   : > { %5248 = vmatpush3.msra.mxu1 %v3683_v17  ;;  %v4888_v30 = vadd.f32 %v4887_v55, %v4886_v54 }
 0x60e   : > { %5249 = vmatprep.subr.mxu1 %v3682_v4  ;;  %v4889_v40 = vpop.f32.mrf.mxu0 }
 0x60f   : > { %5250 = vmatpush3.msra.mxu1 %v3682_v4 }
 0x610   : > { %v4890_v60 = vpop.f32.mrf.mxu0 }
 0x611   : > { %v4891_v23 = vadd.f32 %v4890_v60, %v4889_v40 }
 0x612   : > { %v4892_v3 = vpop.f32.mrf.mxu0 }
 0x613   : > { %v3424_v28 = vadd.f32 %v6470_v45, %v4891_v23 }
 0x614   : > { %v4893_v7 = vpop.f32.mrf.mxu0 }
 0x615   : > { %v4894_v8 = vadd.f32 %v4893_v7, %v4892_v3  ;;  %v3679_v7 = vld [vmem:[%s6851_s5 + $0x18] sm:$0xff] }
 0x616   : > { %v4895_v15 = vpop.f32.mrf.mxu0 }
 0x618   : > { %v4896_v39 = vpop.f32.mrf.mxu0 }
 0x61a   : > { %v4898_v53 = vpop.f32.mrf.mxu0 }
 0x6ac   : > { %v5189_v63 = vpop.f32.mrf.mxu1 }
 0x6ad   : > { %v6768_v5 = vadd.f32 %v5189_v63, %v6673_v50 }
 0x6ae   : > { %v3245_v6 = vpop.f32.mrf.mxu1 }
 0x6af   : > { %v6771_v0 = vadd.f32 %v3245_v6, %v6676_v41 }
 0x6b0   : > { %v5190_v9 = vpop.f32.mrf.mxu1 }
 0x6b1   : > { %v6774_v10 = vadd.f32 %v5190_v9, %v6679_v32  ;;  %v3681_v9 = vld [vmem:[%s6851_s5 + $0x28] sm:$0xff] }
 0x6b2   : > { %v3248_v11 = vpop.f32.mrf.mxu1  ;;  %5251 = vmatprep.subr.mxu1 %v3681_v9 }
 0x6b3   : > { %v6777_v12 = vadd.f32 %v3248_v11, %v6682_v19  ;;  %5252 = vmatpush3.msra.mxu1 %v3681_v9  ;;  %v3678_v11 = vld [vmem:[%s6851_s5 + $0x10] sm:$0xff] }
 0x6b4   : > { %v5193_v13 = vpop.f32.mrf.mxu1 }
 0x6b5   : > { %v6780_v34 = vadd.f32 %v5193_v13, %v6685_v1  ;;  %v4882_v1 = vadd.f32 %v4881_v2, %v4880_v21  ;;  %v3427_v2 = vadd.f32 %v6470_v45, %v4894_v8  ;;  %v3677_v13 = vld [vmem:[%s6851_s5 + $0x8] sm:$0xff] }
 0x6b6   : > { %v3261_v50 = vpop.f32.mrf.mxu1 }
 0x6b7   : > { %v6783_v36 = vadd.f32 %v3261_v50, %v6688_v24  ;;  %v3419_v24 = vadd.f32 %v6470_v45, %v4888_v30  ;;  %v3411_v58 = vadd.f32 %v6470_v45, %v4882_v1 }
 0x6b8   : > { %v5194_v41 = vpop.f32.mrf.mxu1 }
 0x6b9   : > { %v6786_v43 = vadd.f32 %v5194_v41, %v6691_v33  ;;  %v4899_v33 = vpop.f32.mrf.mxu0 }
 0x6ba   : > { %v3264_v32 = vpop.f32.mrf.mxu1  ;;  %v4900_v35 = vadd.f32 %v4899_v33, %v4898_v53 }
 0x6bb   : > { %v6789_v19 = vadd.f32 %v3264_v32, %v6694_v16  ;;  %v4897_v16 = vadd.f32 %v4896_v39, %v4895_v15  ;;  %v3676_v15 = vld [vmem:[%s6851_s5] sm:$0xff] }
 0x6bc   : > { %v5201_v51 = vpop.f32.mrf.mxu1  ;;  %v3435_v17 = vadd.f32 %v6470_v45, %v4900_v35 }
 0x6bd   : > { %v3481_v61 = vadd.f32 %v5201_v51, %v3416_v62  ;;  %v3432_v59 = vadd.f32 %v6470_v45, %v4897_v16  ;;  %v3680_v45 = vld [vmem:[%s6851_s5 + $0x20] sm:$0xff] }
 0x6be   : > { %v3472_v49 = vpop.f32.mrf.mxu1  ;;  %5253 = vmatprep.subr.mxu1 %v3680_v45 }
 0x6bf   : > { %v3473_v20 = vadd.f32 %v3472_v49, %v3408_v52  ;;  %v3505_v42 = vmax.f32 %v3481_v61, 0.0  ;;  %5254 = vmatpush3.msra.mxu1 %v3680_v45 }
 0x6c0   : > { %v5202_v38 = vpop.f32.mrf.mxu1  ;;  %5255 = vmatprep.subr.mxu1 %v3679_v7 }
 0x6c1   : > { %v3484_v44 = vadd.f32 %v5202_v38, %v3419_v24  ;;  %v3503_v26 = vmax.f32 %v3473_v20, 0.0  ;;  %5256 = vmatpush3.msra.mxu1 %v3679_v7 }
 0x6c2   : > { %v3475_v57 = vpop.f32.mrf.mxu1  ;;  %5257 = vmatprep.subr.mxu1 %v3678_v11 }
 0x6c3   : > { %v3476_v18 = vadd.f32 %v3475_v57, %v3411_v58  ;;  %v3506_v22 = vmax.f32 %v3484_v44, 0.0  ;;  %5258 = vmatpush3.msra.mxu1 %v3678_v11 }
 0x6c4   : > { %v5205_v14 = vpop.f32.mrf.mxu1  ;;  %5259 = vmatprep.subr.mxu1 %v3677_v13 }
 0x6c5   : > { %v3504_v31 = vmax.f32 %v3476_v18, 0.0  ;;  %v3512_v4 = vpack.c.bf16 %v3506_v22, %v3505_v42  ;;  %v3497_v29 = vadd.f32 %v5205_v14, %v3432_v59  ;;  %5260 = vmatpush3.msra.mxu1 %v3677_v13 }
 0x6c6   : > { %v3488_v37 = vpop.f32.mrf.mxu1  ;;  %5261 = vmatprep.subr.mxu1 %v3676_v15 }
 0x6c7   : > { %v3511_v27 = vpack.c.bf16 %v3504_v31, %v3503_v26  ;;  %v3489_v25 = vadd.f32 %v3488_v37, %v3424_v28  ;;  %v3509_v63 = vmax.f32 %v3497_v29, 0.0  ;;  %5262 = vmatpush3.msra.mxu1 %v3676_v15 }
 0x6c8   : > { %v5206_v47 = vpop.f32.mrf.mxu1 }
 0x6c9   : > { %v3500_v21 = vadd.f32 %v5206_v47, %v3435_v17  ;;  %5223 = vmatprep.mubr.bf16.mxu0 %v3511_v27  ;;  %v3507_v40 = vmax.f32 %v3489_v25, 0.0 }
 0x6ca   : > { %v3491_v56 = vpop.f32.mrf.mxu1  ;;  %5224 = vmatmul.mubr.bf16.vlgmr.msra.gmra.mxu0 %v3512_v4 }
 0x6cb   : > { %v3492_v54 = vadd.f32 %v3491_v56, %v3427_v2  ;;  %v3510_v55 = vmax.f32 %v3500_v21, 0.0 }
 0x6cd   : > { %v3508_v60 = vmax.f32 %v3492_v54, 0.0  ;;  %v3514_v6 = vpack.c.bf16 %v3510_v55, %v3509_v63 }
 0x6cf   : > { %v3513_v3 = vpack.c.bf16 %v3508_v60, %v3507_v40 }
 0x6d1   : > { %5227 = vmatprep.mubr.bf16.mxu0 %v3513_v3 }
 0x6d2   : > { %5228 = vmatmul.mubr.bf16.gmra.mxu0 %v3514_v6 }
 0x78a   : > { %v5225_v50 = vpop.f32.mrf.mxu0 }
 0x78b   : > { %v3647_v32 = vadd.f32 %v5225_v50, %v6768_v5 }
 0x78c   : > { %v3614_v41 = vpop.f32.mrf.mxu0 }
 0x78d   : > { %v3645_v39 = vadd.f32 %v3614_v41, %v6771_v0  ;;  %v3662_v52 = vadd.f32 %v4451_v46, %v3647_v32 }
 0x78e   : > { %v5226_v30 = vpop.f32.mrf.mxu0 }
 0x78f   : > { %v3660_v48 = vadd.f32 %v4451_v46, %v3645_v39  ;;  %v3648_v1 = vadd.f32 %v5226_v30, %v6774_v10  ;;  %v3670_v20 = vmax.f32 %v3662_v52, 0.0 }
 0x790   : > { %v3617_v51 = vpop.f32.mrf.mxu0 }
 0x791   : > { %v3668_v53 = vmax.f32 %v3660_v48, 0.0  ;;  %v3646_v49 = vadd.f32 %v3617_v51, %v6777_v12  ;;  %v3663_v0 = vadd.f32 %v4451_v46, %v3648_v1 }
 0x792   : > { %v5229_v24 = vpop.f32.mrf.mxu0 }
 0x793   : > { %v3661_v62 = vadd.f32 %v4451_v46, %v3646_v49  ;;  %5263 = vmatprep.mubr.f32.mxu1 %v3668_v53  ;;  %v3651_v44 = vadd.f32 %v5229_v24, %v6780_v34  ;;  %v3671_v10 = vmax.f32 %v3663_v0, 0.0 }
 0x794   : > { %v3630_v38 = vpop.f32.mrf.mxu0 }
 0x795   : > { %v3669_v33 = vmax.f32 %v3661_v62, 0.0  ;;  %v3649_v5 = vadd.f32 %v3630_v38, %v6783_v36  ;;  %v3666_v35 = vadd.f32 %v4451_v46, %v3651_v44 }
 0x796   : > { %v5230_v58 = vpop.f32.mrf.mxu0 }
 0x797   : > { %v3664_v61 = vadd.f32 %v4451_v46, %v3649_v5  ;;  %5264 = vmatmul.mubr.f32.vlgmr.msra.gmra.mxu1 %v3669_v33  ;;  %v3652_v57 = vadd.f32 %v5230_v58, %v6786_v43  ;;  %v3674_v14 = vmax.f32 %v3666_v35, 0.0  ;;  %v4452_v43 = vld [vmem:[%s6852_s6] ss:$0 sm:$0xff] }
 0x798   : > { %v3633_v16 = vpop.f32.mrf.mxu0  ;;  %5266 = vmatprep.mubr.f32.mxu1 %v3670_v20 }
 0x799   : > { %v3672_v12 = vmax.f32 %v3664_v61, 0.0  ;;  %v3650_v23 = vadd.f32 %v3633_v16, %v6789_v19  ;;  %v3667_v36 = vadd.f32 %v4451_v46, %v3652_v57 }
 0x79b   : > { %v3665_v18 = vadd.f32 %v4451_v46, %v3650_v23  ;;  %5267 = vmatmul.mubr.f32.gmra.mxu1 %v3671_v10  ;;  %v3675_v34 = vmax.f32 %v3667_v36, 0.0 }
 0x79c   : > { %5269 = vmatprep.mubr.f32.mxu1 %v3672_v12 }
 0x79d   : > { %v3673_v22 = vmax.f32 %v3665_v18, 0.0 }
 0x79f   : > { %5270 = vmatmul.mubr.f32.gmra.mxu1 %v3673_v22 }
 0x7a0   : > { %5272 = vmatprep.mubr.f32.mxu1 %v3674_v14 }
 0x7a3   : > { %5273 = vmatmul.mubr.f32.gmra.mxu1 %v3675_v34 }
 0x857   : > { %v5265_v19 = vpop.f32.mrf.mxu1 }
 0x858   : > { %v3771_v8 = vadd.f32 %v5265_v19, %v4452_v43 }
 0x859   : > { %v3765_v26 = vpop.f32.mrf.mxu1 }
 0x85a   : > { %3805 = vst [vmem:[%s564_s23 + $0x8] sm:$0xff] %v3771_v8  ;;  %v3766_v31 = vadd.f32 %v4452_v43, %v3765_v26 }
 0x85b   : > { %v5268_v42 = vpop.f32.mrf.mxu1 }
 0x85c   : > { %3804 = vst [vmem:[%s564_s23] sm:$0xff] %v3766_v31  ;;  %v3781_v59 = vadd.f32 %v5268_v42, %v4452_v43 }
 0x85d   : > { %v3775_v37 = vpop.f32.mrf.mxu1 }
 0x85e   : > { %3807 = vst [vmem:[%s564_s23 + $0x18] sm:$0xff] %v3781_v59  ;;  %v3776_v27 = vadd.f32 %v4452_v43, %v3775_v37 }
 0x85f   : > { %v5271_v28 = vpop.f32.mrf.mxu1 }
 0x860   : > { %3806 = vst [vmem:[%s564_s23 + $0x10] sm:$0xff] %v3776_v27  ;;  %v3791_v17 = vadd.f32 %v5271_v28, %v4452_v43 }
 0x861   : > { %v3785_v4 = vpop.f32.mrf.mxu1 }
 0x862   : > { %3809 = vst [vmem:[%s564_s23 + $0x28] sm:$0xff] %v3791_v17  ;;  %v3786_v47 = vadd.f32 %v4452_v43, %v3785_v4 }
 0x863   : > { %v5274_v25 = vpop.f32.mrf.mxu1 }
 0x864   : > { %3808 = vst [vmem:[%s564_s23 + $0x20] sm:$0xff] %v3786_v47  ;;  %v3801_v21 = vadd.f32 %v5274_v25, %v4452_v43 }
 0x865   : > { %v3795_v2 = vpop.f32.mrf.mxu1 }
 0x866   : > { %3811 = vst [vmem:[%s564_s23 + $0x38] sm:$0xff] %v3801_v21  ;;  %v3796_v29 = vadd.f32 %v4452_v43, %v3795_v2 }
 0x868   : > { %3810 = vst [vmem:[%s564_s23 + $0x30] sm:$0xff] %v3796_v29 }
 0x869 PF: > { %p14_p9 = scmp.ge.s32.totalorder %s5630_s28, 4   ;;  %s6854_s24 = smov %s5567_s25 }
 0x86a   : > { %s6855_s25 = smov %s5639_s8  ;;  %s6856_s26 = smov %s5630_s28 }
 0x86b   :  { %16 = sbr.rel (!%p14_p9) target bundleno = 2 (0x2), region = 129 }

</bundles_post_ra>
